<compile_context>
chip_gen: v6e
topology: v6e:2x2x1
jax: 0.10.0
libtpu: 0.0.40
codegen_flags: <defaults>
</compile_context>

<pallas_src>
import jax
import jax.numpy as jnp
import numpy as np
from jax import lax
from jax.experimental import pallas as pl
from jax.experimental.pallas import tpu as pltpu


# ----------------------------- Pallas kernel -------------------------------- #

def _make_model_kernel(num_layers, time_chunk, batch_p, hidden_p, unroll):
    """Fused multi-layer LSTM + FC kernel over one time chunk per grid step.

    Ref order: x2d, [w_ih_t, w_hh_t, bias] * num_layers, fc_w_t, fc_b,
               out, h_sc, c_sc, gx_sc, xn_sc.
    Gate column order inside the kernel is (i, f, o, g), pre-permuted host-side.
    """
    Tt, Bp, Hp = time_chunk, batch_p, hidden_p

    def kernel(*refs):
        x_ref = refs[0]                               # [Tt*Bp, D_in]
        layer_refs = refs[1:1 + 3 * num_layers]
        fc_w_ref = refs[1 + 3 * num_layers]           # [Hp, O]
        fc_b_ref = refs[2 + 3 * num_layers]           # [1, O]
        out_ref = refs[3 + 3 * num_layers]            # [Bp, O]
        h_sc = refs[4 + 3 * num_layers]               # [L, Bp, Hp]
        c_sc = refs[5 + 3 * num_layers]               # [L, Bp, Hp]
        gx_sc = refs[6 + 3 * num_layers]              # [Tt*Bp, 4*Hp]
        xn_sc = refs[7 + 3 * num_layers]              # [Tt*Bp, Hp]

        @pl.when(pl.program_id(0) == 0)
        def _init():
            h_sc[...] = jnp.zeros_like(h_sc)
            c_sc[...] = jnp.zeros_like(c_sc)

        for l in range(num_layers):
            w_ih_t = layer_refs[3 * l][...]           # [D_l, 4*Hp]
            w_hh_t = layer_refs[3 * l + 1][...]       # [Hp, 4*Hp]
            bias = layer_refs[3 * l + 2][...]         # [1, 4*Hp]

            # Hoisted input projection: one large MXU matmul for the whole
            # chunk, bias added once.  Staged into VMEM so the recurrence can
            # slice it with aligned dynamic offsets.
            x_chunk = x_ref[...] if l == 0 else xn_sc[...]
            gx_sc[...] = jnp.dot(x_chunk, w_ih_t,
                                 preferred_element_type=jnp.float32) + bias

            last_layer = (l == num_layers - 1)

            def step(t, carry, _whh=w_hh_t, _last=last_layer):
                h, c = carry
                row = pl.multiple_of(t * Bp, 8)
                gates = gx_sc[pl.ds(row, Bp), :] + jnp.dot(
                    h, _whh, preferred_element_type=jnp.float32)   # [Bp, 4Hp]
                # Gate order (i, f, o, g): sigmoid only on the first 3*Hp
                # lanes, tanh on the last Hp.  All slices are 128-lane aligned.
                sg = jax.nn.sigmoid(gates[:, :3 * Hp])
                i_g = sg[:, 0 * Hp:1 * Hp]
                f_g = sg[:, 1 * Hp:2 * Hp]
                o_g = sg[:, 2 * Hp:3 * Hp]
                g_g = jnp.tanh(gates[:, 3 * Hp:])
                c = f_g * c + i_g * g_g
                h = o_g * jnp.tanh(c)
                if not _last:
                    # Next layer's chunk input, kept on-chip.
                    xn_sc[pl.ds(row, Bp), :] = h
                return (h, c)

            h, c = lax.fori_loop(0, Tt, step, (h_sc[l], c_sc[l]),
                                 unroll=unroll)
            h_sc[l] = h
            c_sc[l] = c

        @pl.when(pl.program_id(0) == pl.num_programs(0) - 1)
        def _finalize():
            # Fused final Linear on the last timestep's hidden state, read
            # back from scratch (decoupled from recurrence live ranges).
            h_last = h_sc[num_layers - 1]
            out_ref[...] = (jnp.dot(h_last, fc_w_ref[...],
                                    preferred_element_type=jnp.float32)
                            + fc_b_ref[...]).astype(out_ref.dtype)

    return kernel


# ------------------------------ Wrapper ------------------------------------ #

def _round_up(v, m):
    return ((v + m - 1) // m) * m


def _pick_time_chunk(T, Bp, target_rows=512):
    """Largest chunk with ~target_rows rows that divides T (Bp is 8-aligned)."""
    tc = max(1, min(T, target_rows // max(Bp, 1)))
    while tc > 1 and T % tc != 0:
        tc -= 1
    return tc


def _prep_lstm_layer(w_ih, w_hh, b, H, Hp, d_in_pad):
    """Pre-transpose, permute gates (i,f,g,o) -> (i,f,o,g), zero-pad H -> Hp."""
    d_in = w_ih.shape[1]
    order = (0, 1, 3, 2)                     # new gate k takes PyTorch gate order[k]
    w_ih_t = jnp.zeros((d_in_pad, 4 * Hp), jnp.float32)
    w_hh_t = jnp.zeros((Hp, 4 * Hp), jnp.float32)
    bias = jnp.zeros((1, 4 * Hp), jnp.float32)
    for dst, src in enumerate(order):
        w_ih_t = w_ih_t.at[:d_in, dst * Hp:dst * Hp + H].set(
            w_ih[src * H:(src + 1) * H, :].T)
        w_hh_t = w_hh_t.at[:H, dst * Hp:dst * Hp + H].set(
            w_hh[src * H:(src + 1) * H, :].T)
        bias = bias.at[:, dst * Hp:dst * Hp + H].set(b[:, src * H:(src + 1) * H])
    return w_ih_t, w_hh_t, bias


def _vmem_limit_bytes(flat_w, Tt, Bp, D_in, Hp, L, O):
    f = 4
    w_bytes = sum(int(np.prod(a.shape)) for a in flat_w) * f * 2   # dbl-buffered
    x_bytes = 2 * Tt * Bp * D_in * f                               # dbl-buffered
    sc_bytes = (2 * L * Bp * Hp + Tt * Bp * 4 * Hp + Tt * Bp * Hp) * f
    o_bytes = 2 * Bp * O * f
    total = int((w_bytes + x_bytes + sc_bytes + o_bytes) * 1.5) + (4 << 20)
    return max(32 << 20, min(total, 64 << 20))


def lstm_model_forward(x, params, *, time_chunk=None):
    """x: [B, T, input_size] (batch-first, PyTorch layout) -> [B, output_size]."""
    B, T, D_in = x.shape
    H = params["lstm"][0][1].shape[1]        # w_hh is [4H, H]
    O = params["fc_w"].shape[0]
    num_layers = len(params["lstm"])

    Bp = _round_up(B, 8)                     # sublane-aligned batch
    Hp = _round_up(H, 128)                   # lane-aligned hidden / gate blocks

    Tt = _pick_time_chunk(T, Bp) if time_chunk is None else time_chunk
    assert T % Tt == 0, "time_chunk must divide T"
    unroll = max(1, min(8, Tt))

    # Pad batch, go time-major, flatten to 2D so the per-chunk input projection
    # is a single large matmul and all per-step slices are sublane-aligned.
    x_p = jnp.zeros((Bp, T, D_in), jnp.float32).at[:B].set(x)
    x_tm = jnp.transpose(x_p, (1, 0, 2)).reshape(T * Bp, D_in)

    const2d = lambda s: (0, 0)
    flat_w = []
    in_specs = [pl.BlockSpec((Tt * Bp, D_in), lambda s: (s, 0))]
    for l, (w_ih, w_hh, b) in enumerate(params["lstm"]):
        d_in_pad = D_in if l == 0 else Hp
        w_ih_t, w_hh_t, bias = _prep_lstm_layer(w_ih, w_hh, b, H, Hp, d_in_pad)
        flat_w += [w_ih_t, w_hh_t, bias]
        in_specs += [pl.BlockSpec(w_ih_t.shape, const2d),
                     pl.BlockSpec(w_hh_t.shape, const2d),
                     pl.BlockSpec(bias.shape, const2d)]
    fc_w_t = jnp.zeros((Hp, O), jnp.float32).at[:H, :].set(params["fc_w"].T)
    fc_b = params["fc_b"]                    # [1, O]
    flat_w += [fc_w_t, fc_b]
    in_specs += [pl.BlockSpec(fc_w_t.shape, const2d),
                 pl.BlockSpec(fc_b.shape, const2d)]

    kernel = _make_model_kernel(num_layers, Tt, Bp, Hp, unroll)

    out_p = pl.pallas_call(
        kernel,
        out_shape=jax.ShapeDtypeStruct((Bp, O), jnp.float32),
        grid=(T // Tt,),
        in_specs=in_specs,
        out_specs=pl.BlockSpec((Bp, O), const2d),
        scratch_shapes=[pltpu.VMEM((num_layers, Bp, Hp), jnp.float32),  # h
                        pltpu.VMEM((num_layers, Bp, Hp), jnp.float32),  # c
                        pltpu.VMEM((Tt * Bp, 4 * Hp), jnp.float32),     # gx
                        pltpu.VMEM((Tt * Bp, Hp), jnp.float32)],        # x_next
        compiler_params=pltpu.CompilerParams(
            dimension_semantics=("arbitrary",),
            vmem_limit_bytes=_vmem_limit_bytes(flat_w, Tt, Bp, D_in, Hp,
                                               num_layers, O)),
    )(x_tm, *flat_w)
    return out_p[:B]


# --------------------------- Parameter init --------------------------------- #

def init_params(key, input_size, hidden_size, num_layers, output_size):
    layers = []
    bound = 1.0 / np.sqrt(hidden_size)
    for l in range(num_layers):
        d_in = input_size if l == 0 else hidden_size
        key, k1, k2, k3, k4 = jax.random.split(key, 5)
        w_ih = jax.random.uniform(k1, (4 * hidden_size, d_in), jnp.float32,
                                  -bound, bound)
        w_hh = jax.random.uniform(k2, (4 * hidden_size, hidden_size),
                                  jnp.float32, -bound, bound)
        b_ih = jax.random.uniform(k3, (4 * hidden_size,), jnp.float32,
                                  -bound, bound)
        b_hh = jax.random.uniform(k4, (4 * hidden_size,), jnp.float32,
                                  -bound, bound)
        layers.append((w_ih, w_hh, (b_ih + b_hh).reshape(1, -1)))
    key, kf1, kf2 = jax.random.split(key, 3)
    fb = 1.0 / np.sqrt(hidden_size)
    fc_w = jax.random.uniform(kf1, (output_size, hidden_size), jnp.float32,
                              -fb, fb)
    fc_b = jax.random.uniform(kf2, (1, output_size), jnp.float32, -fb, fb)
    return {"lstm": layers, "fc_w": fc_w, "fc_b": fc_b}


# --------------------------- Pure-JAX reference ------------------------------ #

def reference_forward(x, params):
    B = x.shape[0]
    seq = jnp.transpose(x, (1, 0, 2))          # [T, B, D]
    for (w_ih, w_hh, b) in params["lstm"]:
        H = w_hh.shape[1]

        def step(carry, x_t):
            h, c = carry
            gates = x_t @ w_ih.T + h @ w_hh.T + b
            i = jax.nn.sigmoid(gates[:, 0 * H:1 * H])
            f = jax.nn.sigmoid(gates[:, 1 * H:2 * H])
            g = jnp.tanh(gates[:, 2 * H:3 * H])
            o = jax.nn.sigmoid(gates[:, 3 * H:4 * H])
            c = f * c + i * g
            h = o * jnp.tanh(c)
            return (h, c), h

        h0 = jnp.zeros((B, H), jnp.float32)
        c0 = jnp.zeros((B, H), jnp.float32)
        _, seq = lax.scan(step, (h0, c0), seq)
    h_last = seq[-1]
    return h_last @ params["fc_w"].T + params["fc_b"]


# --------------------------------- Main -------------------------------------- #

if __name__ == "__main__":
    batch, seq_len = 2, 8
    input_size, hidden_size, num_layers, output_size = 16, 32, 2, 8

    key = jax.random.PRNGKey(0)
    key, kx = jax.random.split(key)
    x = jax.random.normal(kx, (batch, seq_len, input_size), jnp.float32)

    params = init_params(key, input_size, hidden_size, num_layers, output_size)

    # time_chunk=4 -> grid=(2,): exercises the chunked pipeline, the persistent
    # (h, c) carry across grid steps, and the VMEM inter-layer scratch.
    out = jax.block_until_ready(lstm_model_forward(x, params, time_chunk=4))
    ref = jax.block_until_ready(reference_forward(x, params))

    assert out.shape == (batch, output_size)
    np.testing.assert_allclose(np.asarray(out), np.asarray(ref),
                               rtol=1e-5, atol=1e-5)
    print("KERNEL_OK")
</pallas_src>

<mosaic_0001>
module attributes {stable_mosaic.version = 11 : i64} {
  func.func @kernel(%arg0: i32, %arg1: memref<32x16xf32, #tpu.memory_space<vmem>>, %arg2: memref<16x512xf32, #tpu.memory_space<vmem>>, %arg3: memref<128x512xf32, #tpu.memory_space<vmem>>, %arg4: memref<1x512xf32, #tpu.memory_space<vmem>>, %arg5: memref<128x512xf32, #tpu.memory_space<vmem>>, %arg6: memref<128x512xf32, #tpu.memory_space<vmem>>, %arg7: memref<1x512xf32, #tpu.memory_space<vmem>>, %arg8: memref<128x8xf32, #tpu.memory_space<vmem>>, %arg9: memref<1x8xf32, #tpu.memory_space<vmem>>, %arg10: memref<8x8xf32, #tpu.memory_space<vmem>>, %arg11: memref<2x8x128xf32, #tpu.memory_space<vmem>>, %arg12: memref<2x8x128xf32, #tpu.memory_space<vmem>>, %arg13: memref<32x512xf32, #tpu.memory_space<vmem>>, %arg14: memref<32x128xf32, #tpu.memory_space<vmem>>) attributes {dimension_semantics = [#tpu.dimension_semantics<arbitrary>], iteration_bounds = array<i64: 2>, scalar_prefetch = 0 : i64, scratch_operands = 4 : i64, tpu.core_type = #tpu.core_type<tc>, window_params = [{transform_indices = @transform_0, window_bounds = array<i64: 32, 16>}, {pipeline_mode = #tpu.pipeline_mode<synchronous>, transform_indices = @transform_1, window_bounds = array<i64: 16, 512>}, {pipeline_mode = #tpu.pipeline_mode<synchronous>, transform_indices = @transform_2, window_bounds = array<i64: 128, 512>}, {pipeline_mode = #tpu.pipeline_mode<synchronous>, transform_indices = @transform_3, window_bounds = array<i64: 1, 512>}, {pipeline_mode = #tpu.pipeline_mode<synchronous>, transform_indices = @transform_4, window_bounds = array<i64: 128, 512>}, {pipeline_mode = #tpu.pipeline_mode<synchronous>, transform_indices = @transform_5, window_bounds = array<i64: 128, 512>}, {pipeline_mode = #tpu.pipeline_mode<synchronous>, transform_indices = @transform_6, window_bounds = array<i64: 1, 512>}, {pipeline_mode = #tpu.pipeline_mode<synchronous>, transform_indices = @transform_7, window_bounds = array<i64: 128, 8>}, {pipeline_mode = #tpu.pipeline_mode<synchronous>, transform_indices = @transform_8, window_bounds = array<i64: 1, 8>}, {pipeline_mode = #tpu.pipeline_mode<synchronous>, transform_indices = @transform_9, window_bounds = array<i64: 8, 8>}]} {
    %c0_i32 = arith.constant 0 : i32
    %0 = arith.cmpi eq, %arg0, %c0_i32 : i32
    %1 = arith.extui %0 : i1 to i32
    %c0_i32_0 = arith.constant 0 : i32
    %2 = arith.cmpi ne, %1, %c0_i32_0 : i32
    scf.if %2 {
      %cst_87 = arith.constant 0.000000e+00 : f32
      %226 = vector.broadcast %cst_87 : f32 to vector<2x8x128xf32>
      %c0_88 = arith.constant 0 : index
      %c0_89 = arith.constant 0 : index
      %c0_90 = arith.constant 0 : index
      %227 = vector.load %arg11[%c0_88, %c0_89, %c0_90] : memref<2x8x128xf32, #tpu.memory_space<vmem>>, vector<2x8x128xf32>
      tpu.vector_store %arg11[%c0_88, %c0_89, %c0_90], %226 {strides = array<i32>} : memref<2x8x128xf32, #tpu.memory_space<vmem>>, vector<2x8x128xf32>,
      %cst_91 = arith.constant 0.000000e+00 : f32
      %228 = vector.broadcast %cst_91 : f32 to vector<2x8x128xf32>
      %c0_92 = arith.constant 0 : index
      %c0_93 = arith.constant 0 : index
      %c0_94 = arith.constant 0 : index
      %229 = vector.load %arg12[%c0_92, %c0_93, %c0_94] : memref<2x8x128xf32, #tpu.memory_space<vmem>>, vector<2x8x128xf32>
      tpu.vector_store %arg12[%c0_92, %c0_93, %c0_94], %228 {strides = array<i32>} : memref<2x8x128xf32, #tpu.memory_space<vmem>>, vector<2x8x128xf32>,
    } else {
    }
    %c0 = arith.constant 0 : index
    %c0_1 = arith.constant 0 : index
    %3 = vector.load %arg2[%c0, %c0_1] : memref<16x512xf32, #tpu.memory_space<vmem>>, vector<16x512xf32>
    %c0_2 = arith.constant 0 : index
    %c0_3 = arith.constant 0 : index
    %4 = vector.load %arg3[%c0_2, %c0_3] : memref<128x512xf32, #tpu.memory_space<vmem>>, vector<128x512xf32>
    %c0_4 = arith.constant 0 : index
    %c0_5 = arith.constant 0 : index
    %5 = vector.load %arg4[%c0_4, %c0_5] : memref<1x512xf32, #tpu.memory_space<vmem>>, vector<1x512xf32>
    %c0_6 = arith.constant 0 : index
    %c0_7 = arith.constant 0 : index
    %6 = vector.load %arg1[%c0_6, %c0_7] : memref<32x16xf32, #tpu.memory_space<vmem>>, vector<32x16xf32>
    %cst = arith.constant dense<0.000000e+00> : vector<32x512xf32>
    %7 = tpu.matmul %6, %3, %cst {dimension_numbers = #tpu.dot_dimension_numbers<[1], [0], [0], [1], [0, 0, 1, 1], [], []>} : vector<32x16xf32>, vector<16x512xf32>, vector<32x512xf32> -> vector<32x512xf32>
    %8 = vector.broadcast %5 : vector<1x512xf32> to vector<32x512xf32>
    %9 = arith.addf %7, %8 : vector<32x512xf32>
    %c0_8 = arith.constant 0 : index
    %c0_9 = arith.constant 0 : index
    %10 = vector.load %arg13[%c0_8, %c0_9] : memref<32x512xf32, #tpu.memory_space<vmem>>, vector<32x512xf32>
    tpu.vector_store %arg13[%c0_8, %c0_9], %9 {strides = array<i32>} : memref<32x512xf32, #tpu.memory_space<vmem>>, vector<32x512xf32>,
    %c0_10 = arith.constant 0 : index
    %c0_11 = arith.constant 0 : index
    %c0_12 = arith.constant 0 : index
    %11 = vector.load %arg11[%c0_10, %c0_11, %c0_12] : memref<2x8x128xf32, #tpu.memory_space<vmem>>, vector<1x8x128xf32>
    %12 = vector.shape_cast %11 : vector<1x8x128xf32> to vector<8x128xf32>
    %c0_13 = arith.constant 0 : index
    %c0_14 = arith.constant 0 : index
    %c0_15 = arith.constant 0 : index
    %13 = vector.load %arg12[%c0_13, %c0_14, %c0_15] : memref<2x8x128xf32, #tpu.memory_space<vmem>>, vector<1x8x128xf32>
    %14 = vector.shape_cast %13 : vector<1x8x128xf32> to vector<8x128xf32>
    %c0_i32_16 = arith.constant 0 : i32
    %c8_i32 = arith.constant 8 : i32
    %15 = arith.muli %c0_i32_16, %c8_i32 : i32
    %16 = tpu.assume_multiple %15, 8 : i32
    %17 = arith.index_cast %16 : i32 to index
    %c0_17 = arith.constant 0 : index
    %18 = vector.load %arg13[%17, %c0_17] : memref<32x512xf32, #tpu.memory_space<vmem>>, vector<8x512xf32>
    %cst_18 = arith.constant dense<0.000000e+00> : vector<8x512xf32>
    %19 = tpu.matmul %12, %4, %cst_18 {dimension_numbers = #tpu.dot_dimension_numbers<[1], [0], [0], [1], [0, 0, 1, 1], [], []>} : vector<8x128xf32>, vector<128x512xf32>, vector<8x512xf32> -> vector<8x512xf32>
    %20 = arith.addf %18, %19 : vector<8x512xf32>
    %21 = vector.extract_strided_slice %20 {offsets = [0, 0], sizes = [8, 384], strides = [1, 1]} : vector<8x512xf32> to vector<8x384xf32>
    %22 = arith.negf %21 : vector<8x384xf32>
    %23 = math.exp %22 : vector<8x384xf32>
    %cst_19 = arith.constant 1.000000e+00 : f32
    %24 = vector.broadcast %cst_19 : f32 to vector<8x384xf32>
    %25 = arith.addf %24, %23 : vector<8x384xf32>
    %26 = arith.divf %24, %25 : vector<8x384xf32>
    %27 = vector.extract_strided_slice %26 {offsets = [0, 0], sizes = [8, 128], strides = [1, 1]} : vector<8x384xf32> to vector<8x128xf32>
    %28 = vector.extract_strided_slice %26 {offsets = [0, 128], sizes = [8, 128], strides = [1, 1]} : vector<8x384xf32> to vector<8x128xf32>
    %29 = vector.extract_strided_slice %26 {offsets = [0, 256], sizes = [8, 128], strides = [1, 1]} : vector<8x384xf32> to vector<8x128xf32>
    %30 = vector.extract_strided_slice %20 {offsets = [0, 384], sizes = [8, 128], strides = [1, 1]} : vector<8x512xf32> to vector<8x128xf32>
    %31 = math.tanh %30 : vector<8x128xf32>
    %32 = arith.mulf %28, %14 : vector<8x128xf32>
    %33 = arith.mulf %27, %31 : vector<8x128xf32>
    %34 = arith.addf %32, %33 : vector<8x128xf32>
    %35 = math.tanh %34 : vector<8x128xf32>
    %36 = arith.mulf %29, %35 : vector<8x128xf32>
    %37 = arith.index_cast %16 : i32 to index
    %c0_20 = arith.constant 0 : index
    %38 = vector.load %arg14[%37, %c0_20] : memref<32x128xf32, #tpu.memory_space<vmem>>, vector<8x128xf32>
    tpu.vector_store %arg14[%37, %c0_20], %36 {strides = array<i32>} : memref<32x128xf32, #tpu.memory_space<vmem>>, vector<8x128xf32>,
    %c1_i32 = arith.constant 1 : i32
    %c8_i32_21 = arith.constant 8 : i32
    %39 = arith.muli %c1_i32, %c8_i32_21 : i32
    %40 = tpu.assume_multiple %39, 8 : i32
    %41 = arith.index_cast %40 : i32 to index
    %c0_22 = arith.constant 0 : index
    %42 = vector.load %arg13[%41, %c0_22] : memref<32x512xf32, #tpu.memory_space<vmem>>, vector<8x512xf32>
    %cst_23 = arith.constant dense<0.000000e+00> : vector<8x512xf32>
    %43 = tpu.matmul %36, %4, %cst_23 {dimension_numbers = #tpu.dot_dimension_numbers<[1], [0], [0], [1], [0, 0, 1, 1], [], []>} : vector<8x128xf32>, vector<128x512xf32>, vector<8x512xf32> -> vector<8x512xf32>
    %44 = arith.addf %42, %43 : vector<8x512xf32>
    %45 = vector.extract_strided_slice %44 {offsets = [0, 0], sizes = [8, 384], strides = [1, 1]} : vector<8x512xf32> to vector<8x384xf32>
    %46 = arith.negf %45 : vector<8x384xf32>
    %47 = math.exp %46 : vector<8x384xf32>
    %cst_24 = arith.constant 1.000000e+00 : f32
    %48 = vector.broadcast %cst_24 : f32 to vector<8x384xf32>
    %49 = arith.addf %48, %47 : vector<8x384xf32>
    %50 = arith.divf %48, %49 : vector<8x384xf32>
    %51 = vector.extract_strided_slice %50 {offsets = [0, 0], sizes = [8, 128], strides = [1, 1]} : vector<8x384xf32> to vector<8x128xf32>
    %52 = vector.extract_strided_slice %50 {offsets = [0, 128], sizes = [8, 128], strides = [1, 1]} : vector<8x384xf32> to vector<8x128xf32>
    %53 = vector.extract_strided_slice %50 {offsets = [0, 256], sizes = [8, 128], strides = [1, 1]} : vector<8x384xf32> to vector<8x128xf32>
    %54 = vector.extract_strided_slice %44 {offsets = [0, 384], sizes = [8, 128], strides = [1, 1]} : vector<8x512xf32> to vector<8x128xf32>
    %55 = math.tanh %54 : vector<8x128xf32>
    %56 = arith.mulf %52, %34 : vector<8x128xf32>
    %57 = arith.mulf %51, %55 : vector<8x128xf32>
    %58 = arith.addf %56, %57 : vector<8x128xf32>
    %59 = math.tanh %58 : vector<8x128xf32>
    %60 = arith.mulf %53, %59 : vector<8x128xf32>
    %61 = arith.index_cast %40 : i32 to index
    %c0_25 = arith.constant 0 : index
    %62 = vector.load %arg14[%61, %c0_25] : memref<32x128xf32, #tpu.memory_space<vmem>>, vector<8x128xf32>
    tpu.vector_store %arg14[%61, %c0_25], %60 {strides = array<i32>} : memref<32x128xf32, #tpu.memory_space<vmem>>, vector<8x128xf32>,
    %c2_i32 = arith.constant 2 : i32
    %c8_i32_26 = arith.constant 8 : i32
    %63 = arith.muli %c2_i32, %c8_i32_26 : i32
    %64 = tpu.assume_multiple %63, 8 : i32
    %65 = arith.index_cast %64 : i32 to index
    %c0_27 = arith.constant 0 : index
    %66 = vector.load %arg13[%65, %c0_27] : memref<32x512xf32, #tpu.memory_space<vmem>>, vector<8x512xf32>
    %cst_28 = arith.constant dense<0.000000e+00> : vector<8x512xf32>
    %67 = tpu.matmul %60, %4, %cst_28 {dimension_numbers = #tpu.dot_dimension_numbers<[1], [0], [0], [1], [0, 0, 1, 1], [], []>} : vector<8x128xf32>, vector<128x512xf32>, vector<8x512xf32> -> vector<8x512xf32>
    %68 = arith.addf %66, %67 : vector<8x512xf32>
    %69 = vector.extract_strided_slice %68 {offsets = [0, 0], sizes = [8, 384], strides = [1, 1]} : vector<8x512xf32> to vector<8x384xf32>
    %70 = arith.negf %69 : vector<8x384xf32>
    %71 = math.exp %70 : vector<8x384xf32>
    %cst_29 = arith.constant 1.000000e+00 : f32
    %72 = vector.broadcast %cst_29 : f32 to vector<8x384xf32>
    %73 = arith.addf %72, %71 : vector<8x384xf32>
    %74 = arith.divf %72, %73 : vector<8x384xf32>
    %75 = vector.extract_strided_slice %74 {offsets = [0, 0], sizes = [8, 128], strides = [1, 1]} : vector<8x384xf32> to vector<8x128xf32>
    %76 = vector.extract_strided_slice %74 {offsets = [0, 128], sizes = [8, 128], strides = [1, 1]} : vector<8x384xf32> to vector<8x128xf32>
    %77 = vector.extract_strided_slice %74 {offsets = [0, 256], sizes = [8, 128], strides = [1, 1]} : vector<8x384xf32> to vector<8x128xf32>
    %78 = vector.extract_strided_slice %68 {offsets = [0, 384], sizes = [8, 128], strides = [1, 1]} : vector<8x512xf32> to vector<8x128xf32>
    %79 = math.tanh %78 : vector<8x128xf32>
    %80 = arith.mulf %76, %58 : vector<8x128xf32>
    %81 = arith.mulf %75, %79 : vector<8x128xf32>
    %82 = arith.addf %80, %81 : vector<8x128xf32>
    %83 = math.tanh %82 : vector<8x128xf32>
    %84 = arith.mulf %77, %83 : vector<8x128xf32>
    %85 = arith.index_cast %64 : i32 to index
    %c0_30 = arith.constant 0 : index
    %86 = vector.load %arg14[%85, %c0_30] : memref<32x128xf32, #tpu.memory_space<vmem>>, vector<8x128xf32>
    tpu.vector_store %arg14[%85, %c0_30], %84 {strides = array<i32>} : memref<32x128xf32, #tpu.memory_space<vmem>>, vector<8x128xf32>,
    %c3_i32 = arith.constant 3 : i32
    %c8_i32_31 = arith.constant 8 : i32
    %87 = arith.muli %c3_i32, %c8_i32_31 : i32
    %88 = tpu.assume_multiple %87, 8 : i32
    %89 = arith.index_cast %88 : i32 to index
    %c0_32 = arith.constant 0 : index
    %90 = vector.load %arg13[%89, %c0_32] : memref<32x512xf32, #tpu.memory_space<vmem>>, vector<8x512xf32>
    %cst_33 = arith.constant dense<0.000000e+00> : vector<8x512xf32>
    %91 = tpu.matmul %84, %4, %cst_33 {dimension_numbers = #tpu.dot_dimension_numbers<[1], [0], [0], [1], [0, 0, 1, 1], [], []>} : vector<8x128xf32>, vector<128x512xf32>, vector<8x512xf32> -> vector<8x512xf32>
    %92 = arith.addf %90, %91 : vector<8x512xf32>
    %93 = vector.extract_strided_slice %92 {offsets = [0, 0], sizes = [8, 384], strides = [1, 1]} : vector<8x512xf32> to vector<8x384xf32>
    %94 = arith.negf %93 : vector<8x384xf32>
    %95 = math.exp %94 : vector<8x384xf32>
    %cst_34 = arith.constant 1.000000e+00 : f32
    %96 = vector.broadcast %cst_34 : f32 to vector<8x384xf32>
    %97 = arith.addf %96, %95 : vector<8x384xf32>
    %98 = arith.divf %96, %97 : vector<8x384xf32>
    %99 = vector.extract_strided_slice %98 {offsets = [0, 0], sizes = [8, 128], strides = [1, 1]} : vector<8x384xf32> to vector<8x128xf32>
    %100 = vector.extract_strided_slice %98 {offsets = [0, 128], sizes = [8, 128], strides = [1, 1]} : vector<8x384xf32> to vector<8x128xf32>
    %101 = vector.extract_strided_slice %98 {offsets = [0, 256], sizes = [8, 128], strides = [1, 1]} : vector<8x384xf32> to vector<8x128xf32>
    %102 = vector.extract_strided_slice %92 {offsets = [0, 384], sizes = [8, 128], strides = [1, 1]} : vector<8x512xf32> to vector<8x128xf32>
    %103 = math.tanh %102 : vector<8x128xf32>
    %104 = arith.mulf %100, %82 : vector<8x128xf32>
    %105 = arith.mulf %99, %103 : vector<8x128xf32>
    %106 = arith.addf %104, %105 : vector<8x128xf32>
    %107 = math.tanh %106 : vector<8x128xf32>
    %108 = arith.mulf %101, %107 : vector<8x128xf32>
    %109 = arith.index_cast %88 : i32 to index
    %c0_35 = arith.constant 0 : index
    %110 = vector.load %arg14[%109, %c0_35] : memref<32x128xf32, #tpu.memory_space<vmem>>, vector<8x128xf32>
    tpu.vector_store %arg14[%109, %c0_35], %108 {strides = array<i32>} : memref<32x128xf32, #tpu.memory_space<vmem>>, vector<8x128xf32>,
    %c4_i32 = arith.constant 4 : i32
    %c0_36 = arith.constant 0 : index
    %c0_37 = arith.constant 0 : index
    %c0_38 = arith.constant 0 : index
    %111 = vector.load %arg11[%c0_36, %c0_37, %c0_38] : memref<2x8x128xf32, #tpu.memory_space<vmem>>, vector<1x8x128xf32>
    %112 = vector.shape_cast %111 : vector<1x8x128xf32> to vector<8x128xf32>
    %113 = vector.shape_cast %108 : vector<8x128xf32> to vector<1x8x128xf32>
    tpu.vector_store %arg11[%c0_36, %c0_37, %c0_38], %113 {strides = array<i32>} : memref<2x8x128xf32, #tpu.memory_space<vmem>>, vector<1x8x128xf32>,
    %c0_39 = arith.constant 0 : index
    %c0_40 = arith.constant 0 : index
    %c0_41 = arith.constant 0 : index
    %114 = vector.load %arg12[%c0_39, %c0_40, %c0_41] : memref<2x8x128xf32, #tpu.memory_space<vmem>>, vector<1x8x128xf32>
    %115 = vector.shape_cast %114 : vector<1x8x128xf32> to vector<8x128xf32>
    %116 = vector.shape_cast %106 : vector<8x128xf32> to vector<1x8x128xf32>
    tpu.vector_store %arg12[%c0_39, %c0_40, %c0_41], %116 {strides = array<i32>} : memref<2x8x128xf32, #tpu.memory_space<vmem>>, vector<1x8x128xf32>,
    %c0_42 = arith.constant 0 : index
    %c0_43 = arith.constant 0 : index
    %117 = vector.load %arg5[%c0_42, %c0_43] : memref<128x512xf32, #tpu.memory_space<vmem>>, vector<128x512xf32>
    %c0_44 = arith.constant 0 : index
    %c0_45 = arith.constant 0 : index
    %118 = vector.load %arg6[%c0_44, %c0_45] : memref<128x512xf32, #tpu.memory_space<vmem>>, vector<128x512xf32>
    %c0_46 = arith.constant 0 : index
    %c0_47 = arith.constant 0 : index
    %119 = vector.load %arg7[%c0_46, %c0_47] : memref<1x512xf32, #tpu.memory_space<vmem>>, vector<1x512xf32>
    %c0_48 = arith.constant 0 : index
    %c0_49 = arith.constant 0 : index
    %120 = vector.load %arg14[%c0_48, %c0_49] : memref<32x128xf32, #tpu.memory_space<vmem>>, vector<32x128xf32>
    %cst_50 = arith.constant dense<0.000000e+00> : vector<32x512xf32>
    %121 = tpu.matmul %120, %117, %cst_50 {dimension_numbers = #tpu.dot_dimension_numbers<[1], [0], [0], [1], [0, 0, 1, 1], [], []>} : vector<32x128xf32>, vector<128x512xf32>, vector<32x512xf32> -> vector<32x512xf32>
    %122 = vector.broadcast %119 : vector<1x512xf32> to vector<32x512xf32>
    %123 = arith.addf %121, %122 : vector<32x512xf32>
    %c0_51 = arith.constant 0 : index
    %c0_52 = arith.constant 0 : index
    %124 = vector.load %arg13[%c0_51, %c0_52] : memref<32x512xf32, #tpu.memory_space<vmem>>, vector<32x512xf32>
    tpu.vector_store %arg13[%c0_51, %c0_52], %123 {strides = array<i32>} : memref<32x512xf32, #tpu.memory_space<vmem>>, vector<32x512xf32>,
    %c1 = arith.constant 1 : index
    %c0_53 = arith.constant 0 : index
    %c0_54 = arith.constant 0 : index
    %125 = vector.load %arg11[%c1, %c0_53, %c0_54] : memref<2x8x128xf32, #tpu.memory_space<vmem>>, vector<1x8x128xf32>
    %126 = vector.shape_cast %125 : vector<1x8x128xf32> to vector<8x128xf32>
    %c1_55 = arith.constant 1 : index
    %c0_56 = arith.constant 0 : index
    %c0_57 = arith.constant 0 : index
    %127 = vector.load %arg12[%c1_55, %c0_56, %c0_57] : memref<2x8x128xf32, #tpu.memory_space<vmem>>, vector<1x8x128xf32>
    %128 = vector.shape_cast %127 : vector<1x8x128xf32> to vector<8x128xf32>
    %c0_i32_58 = arith.constant 0 : i32
    %c8_i32_59 = arith.constant 8 : i32
    %129 = arith.muli %c0_i32_58, %c8_i32_59 : i32
    %130 = tpu.assume_multiple %129, 8 : i32
    %131 = arith.index_cast %130 : i32 to index
    %c0_60 = arith.constant 0 : index
    %132 = vector.load %arg13[%131, %c0_60] : memref<32x512xf32, #tpu.memory_space<vmem>>, vector<8x512xf32>
    %cst_61 = arith.constant dense<0.000000e+00> : vector<8x512xf32>
    %133 = tpu.matmul %126, %118, %cst_61 {dimension_numbers = #tpu.dot_dimension_numbers<[1], [0], [0], [1], [0, 0, 1, 1], [], []>} : vector<8x128xf32>, vector<128x512xf32>, vector<8x512xf32> -> vector<8x512xf32>
    %134 = arith.addf %132, %133 : vector<8x512xf32>
    %135 = vector.extract_strided_slice %134 {offsets = [0, 0], sizes = [8, 384], strides = [1, 1]} : vector<8x512xf32> to vector<8x384xf32>
    %136 = arith.negf %135 : vector<8x384xf32>
    %137 = math.exp %136 : vector<8x384xf32>
    %cst_62 = arith.constant 1.000000e+00 : f32
    %138 = vector.broadcast %cst_62 : f32 to vector<8x384xf32>
    %139 = arith.addf %138, %137 : vector<8x384xf32>
    %140 = arith.divf %138, %139 : vector<8x384xf32>
    %141 = vector.extract_strided_slice %140 {offsets = [0, 0], sizes = [8, 128], strides = [1, 1]} : vector<8x384xf32> to vector<8x128xf32>
    %142 = vector.extract_strided_slice %140 {offsets = [0, 128], sizes = [8, 128], strides = [1, 1]} : vector<8x384xf32> to vector<8x128xf32>
    %143 = vector.extract_strided_slice %140 {offsets = [0, 256], sizes = [8, 128], strides = [1, 1]} : vector<8x384xf32> to vector<8x128xf32>
    %144 = vector.extract_strided_slice %134 {offsets = [0, 384], sizes = [8, 128], strides = [1, 1]} : vector<8x512xf32> to vector<8x128xf32>
    %145 = math.tanh %144 : vector<8x128xf32>
    %146 = arith.mulf %142, %128 : vector<8x128xf32>
    %147 = arith.mulf %141, %145 : vector<8x128xf32>
    %148 = arith.addf %146, %147 : vector<8x128xf32>
    %149 = math.tanh %148 : vector<8x128xf32>
    %150 = arith.mulf %143, %149 : vector<8x128xf32>
    %c1_i32_63 = arith.constant 1 : i32
    %c8_i32_64 = arith.constant 8 : i32
    %151 = arith.muli %c1_i32_63, %c8_i32_64 : i32
    %152 = tpu.assume_multiple %151, 8 : i32
    %153 = arith.index_cast %152 : i32 to index
    %c0_65 = arith.constant 0 : index
    %154 = vector.load %arg13[%153, %c0_65] : memref<32x512xf32, #tpu.memory_space<vmem>>, vector<8x512xf32>
    %cst_66 = arith.constant dense<0.000000e+00> : vector<8x512xf32>
    %155 = tpu.matmul %150, %118, %cst_66 {dimension_numbers = #tpu.dot_dimension_numbers<[1], [0], [0], [1], [0, 0, 1, 1], [], []>} : vector<8x128xf32>, vector<128x512xf32>, vector<8x512xf32> -> vector<8x512xf32>
    %156 = arith.addf %154, %155 : vector<8x512xf32>
    %157 = vector.extract_strided_slice %156 {offsets = [0, 0], sizes = [8, 384], strides = [1, 1]} : vector<8x512xf32> to vector<8x384xf32>
    %158 = arith.negf %157 : vector<8x384xf32>
    %159 = math.exp %158 : vector<8x384xf32>
    %cst_67 = arith.constant 1.000000e+00 : f32
    %160 = vector.broadcast %cst_67 : f32 to vector<8x384xf32>
    %161 = arith.addf %160, %159 : vector<8x384xf32>
    %162 = arith.divf %160, %161 : vector<8x384xf32>
    %163 = vector.extract_strided_slice %162 {offsets = [0, 0], sizes = [8, 128], strides = [1, 1]} : vector<8x384xf32> to vector<8x128xf32>
    %164 = vector.extract_strided_slice %162 {offsets = [0, 128], sizes = [8, 128], strides = [1, 1]} : vector<8x384xf32> to vector<8x128xf32>
    %165 = vector.extract_strided_slice %162 {offsets = [0, 256], sizes = [8, 128], strides = [1, 1]} : vector<8x384xf32> to vector<8x128xf32>
    %166 = vector.extract_strided_slice %156 {offsets = [0, 384], sizes = [8, 128], strides = [1, 1]} : vector<8x512xf32> to vector<8x128xf32>
    %167 = math.tanh %166 : vector<8x128xf32>
    %168 = arith.mulf %164, %148 : vector<8x128xf32>
    %169 = arith.mulf %163, %167 : vector<8x128xf32>
    %170 = arith.addf %168, %169 : vector<8x128xf32>
    %171 = math.tanh %170 : vector<8x128xf32>
    %172 = arith.mulf %165, %171 : vector<8x128xf32>
    %c2_i32_68 = arith.constant 2 : i32
    %c8_i32_69 = arith.constant 8 : i32
    %173 = arith.muli %c2_i32_68, %c8_i32_69 : i32
    %174 = tpu.assume_multiple %173, 8 : i32
    %175 = arith.index_cast %174 : i32 to index
    %c0_70 = arith.constant 0 : index
    %176 = vector.load %arg13[%175, %c0_70] : memref<32x512xf32, #tpu.memory_space<vmem>>, vector<8x512xf32>
    %cst_71 = arith.constant dense<0.000000e+00> : vector<8x512xf32>
    %177 = tpu.matmul %172, %118, %cst_71 {dimension_numbers = #tpu.dot_dimension_numbers<[1], [0], [0], [1], [0, 0, 1, 1], [], []>} : vector<8x128xf32>, vector<128x512xf32>, vector<8x512xf32> -> vector<8x512xf32>
    %178 = arith.addf %176, %177 : vector<8x512xf32>
    %179 = vector.extract_strided_slice %178 {offsets = [0, 0], sizes = [8, 384], strides = [1, 1]} : vector<8x512xf32> to vector<8x384xf32>
    %180 = arith.negf %179 : vector<8x384xf32>
    %181 = math.exp %180 : vector<8x384xf32>
    %cst_72 = arith.constant 1.000000e+00 : f32
    %182 = vector.broadcast %cst_72 : f32 to vector<8x384xf32>
    %183 = arith.addf %182, %181 : vector<8x384xf32>
    %184 = arith.divf %182, %183 : vector<8x384xf32>
    %185 = vector.extract_strided_slice %184 {offsets = [0, 0], sizes = [8, 128], strides = [1, 1]} : vector<8x384xf32> to vector<8x128xf32>
    %186 = vector.extract_strided_slice %184 {offsets = [0, 128], sizes = [8, 128], strides = [1, 1]} : vector<8x384xf32> to vector<8x128xf32>
    %187 = vector.extract_strided_slice %184 {offsets = [0, 256], sizes = [8, 128], strides = [1, 1]} : vector<8x384xf32> to vector<8x128xf32>
    %188 = vector.extract_strided_slice %178 {offsets = [0, 384], sizes = [8, 128], strides = [1, 1]} : vector<8x512xf32> to vector<8x128xf32>
    %189 = math.tanh %188 : vector<8x128xf32>
    %190 = arith.mulf %186, %170 : vector<8x128xf32>
    %191 = arith.mulf %185, %189 : vector<8x128xf32>
    %192 = arith.addf %190, %191 : vector<8x128xf32>
    %193 = math.tanh %192 : vector<8x128xf32>
    %194 = arith.mulf %187, %193 : vector<8x128xf32>
    %c3_i32_73 = arith.constant 3 : i32
    %c8_i32_74 = arith.constant 8 : i32
    %195 = arith.muli %c3_i32_73, %c8_i32_74 : i32
    %196 = tpu.assume_multiple %195, 8 : i32
    %197 = arith.index_cast %196 : i32 to index
    %c0_75 = arith.constant 0 : index
    %198 = vector.load %arg13[%197, %c0_75] : memref<32x512xf32, #tpu.memory_space<vmem>>, vector<8x512xf32>
    %cst_76 = arith.constant dense<0.000000e+00> : vector<8x512xf32>
    %199 = tpu.matmul %194, %118, %cst_76 {dimension_numbers = #tpu.dot_dimension_numbers<[1], [0], [0], [1], [0, 0, 1, 1], [], []>} : vector<8x128xf32>, vector<128x512xf32>, vector<8x512xf32> -> vector<8x512xf32>
    %200 = arith.addf %198, %199 : vector<8x512xf32>
    %201 = vector.extract_strided_slice %200 {offsets = [0, 0], sizes = [8, 384], strides = [1, 1]} : vector<8x512xf32> to vector<8x384xf32>
    %202 = arith.negf %201 : vector<8x384xf32>
    %203 = math.exp %202 : vector<8x384xf32>
    %cst_77 = arith.constant 1.000000e+00 : f32
    %204 = vector.broadcast %cst_77 : f32 to vector<8x384xf32>
    %205 = arith.addf %204, %203 : vector<8x384xf32>
    %206 = arith.divf %204, %205 : vector<8x384xf32>
    %207 = vector.extract_strided_slice %206 {offsets = [0, 0], sizes = [8, 128], strides = [1, 1]} : vector<8x384xf32> to vector<8x128xf32>
    %208 = vector.extract_strided_slice %206 {offsets = [0, 128], sizes = [8, 128], strides = [1, 1]} : vector<8x384xf32> to vector<8x128xf32>
    %209 = vector.extract_strided_slice %206 {offsets = [0, 256], sizes = [8, 128], strides = [1, 1]} : vector<8x384xf32> to vector<8x128xf32>
    %210 = vector.extract_strided_slice %200 {offsets = [0, 384], sizes = [8, 128], strides = [1, 1]} : vector<8x512xf32> to vector<8x128xf32>
    %211 = math.tanh %210 : vector<8x128xf32>
    %212 = arith.mulf %208, %192 : vector<8x128xf32>
    %213 = arith.mulf %207, %211 : vector<8x128xf32>
    %214 = arith.addf %212, %213 : vector<8x128xf32>
    %215 = math.tanh %214 : vector<8x128xf32>
    %216 = arith.mulf %209, %215 : vector<8x128xf32>
    %c4_i32_78 = arith.constant 4 : i32
    %c1_79 = arith.constant 1 : index
    %c0_80 = arith.constant 0 : index
    %c0_81 = arith.constant 0 : index
    %217 = vector.load %arg11[%c1_79, %c0_80, %c0_81] : memref<2x8x128xf32, #tpu.memory_space<vmem>>, vector<1x8x128xf32>
    %218 = vector.shape_cast %217 : vector<1x8x128xf32> to vector<8x128xf32>
    %219 = vector.shape_cast %216 : vector<8x128xf32> to vector<1x8x128xf32>
    tpu.vector_store %arg11[%c1_79, %c0_80, %c0_81], %219 {strides = array<i32>} : memref<2x8x128xf32, #tpu.memory_space<vmem>>, vector<1x8x128xf32>,
    %c1_82 = arith.constant 1 : index
    %c0_83 = arith.constant 0 : index
    %c0_84 = arith.constant 0 : index
    %220 = vector.load %arg12[%c1_82, %c0_83, %c0_84] : memref<2x8x128xf32, #tpu.memory_space<vmem>>, vector<1x8x128xf32>
    %221 = vector.shape_cast %220 : vector<1x8x128xf32> to vector<8x128xf32>
    %222 = vector.shape_cast %214 : vector<8x128xf32> to vector<1x8x128xf32>
    tpu.vector_store %arg12[%c1_82, %c0_83, %c0_84], %222 {strides = array<i32>} : memref<2x8x128xf32, #tpu.memory_space<vmem>>, vector<1x8x128xf32>,
    %c1_i32_85 = arith.constant 1 : i32
    %223 = arith.cmpi eq, %arg0, %c1_i32_85 : i32
    %224 = arith.extui %223 : i1 to i32
    %c0_i32_86 = arith.constant 0 : i32
    %225 = arith.cmpi ne, %224, %c0_i32_86 : i32
    scf.if %225 {
      %c1_87 = arith.constant 1 : index
      %c0_88 = arith.constant 0 : index
      %c0_89 = arith.constant 0 : index
      %226 = vector.load %arg11[%c1_87, %c0_88, %c0_89] : memref<2x8x128xf32, #tpu.memory_space<vmem>>, vector<1x8x128xf32>
      %227 = vector.shape_cast %226 : vector<1x8x128xf32> to vector<8x128xf32>
      %c0_90 = arith.constant 0 : index
      %c0_91 = arith.constant 0 : index
      %228 = vector.load %arg8[%c0_90, %c0_91] : memref<128x8xf32, #tpu.memory_space<vmem>>, vector<128x8xf32>
      %cst_92 = arith.constant dense<0.000000e+00> : vector<8x8xf32>
      %229 = tpu.matmul %227, %228, %cst_92 {dimension_numbers = #tpu.dot_dimension_numbers<[1], [0], [0], [1], [0, 0, 1, 1], [], []>} : vector<8x128xf32>, vector<128x8xf32>, vector<8x8xf32> -> vector<8x8xf32>
      %c0_93 = arith.constant 0 : index
      %c0_94 = arith.constant 0 : index
      %230 = vector.load %arg9[%c0_93, %c0_94] : memref<1x8xf32, #tpu.memory_space<vmem>>, vector<1x8xf32>
      %231 = vector.broadcast %230 : vector<1x8xf32> to vector<8x8xf32>
      %232 = arith.addf %229, %231 : vector<8x8xf32>
      %c0_95 = arith.constant 0 : index
      %c0_96 = arith.constant 0 : index
      %233 = vector.load %arg10[%c0_95, %c0_96] : memref<8x8xf32, #tpu.memory_space<vmem>>, vector<8x8xf32>
      tpu.vector_store %arg10[%c0_95, %c0_96], %232 {strides = array<i32>} : memref<8x8xf32, #tpu.memory_space<vmem>>, vector<8x8xf32>,
    } else {
    }
    return
  }
  func.func @transform_0(%arg0: i32) -> (i32, i32) {
    %c0_i32 = arith.constant 0 : i32
    %c0_i32_0 = arith.constant 0 : i32
    return %arg0, %c0_i32 : i32, i32
  }
  func.func @transform_1(%arg0: i32) -> (i32, i32) {
    %c0_i32 = arith.constant 0 : i32
    %c0_i32_0 = arith.constant 0 : i32
    %c0_i32_1 = arith.constant 0 : i32
    return %c0_i32, %c0_i32_0 : i32, i32
  }
  func.func @transform_2(%arg0: i32) -> (i32, i32) {
    %c0_i32 = arith.constant 0 : i32
    %c0_i32_0 = arith.constant 0 : i32
    %c0_i32_1 = arith.constant 0 : i32
    return %c0_i32, %c0_i32_0 : i32, i32
  }
  func.func @transform_3(%arg0: i32) -> (i32, i32) {
    %c0_i32 = arith.constant 0 : i32
    %c0_i32_0 = arith.constant 0 : i32
    %c0_i32_1 = arith.constant 0 : i32
    return %c0_i32, %c0_i32_0 : i32, i32
  }
  func.func @transform_4(%arg0: i32) -> (i32, i32) {
    %c0_i32 = arith.constant 0 : i32
    %c0_i32_0 = arith.constant 0 : i32
    %c0_i32_1 = arith.constant 0 : i32
    return %c0_i32, %c0_i32_0 : i32, i32
  }
  func.func @transform_5(%arg0: i32) -> (i32, i32) {
    %c0_i32 = arith.constant 0 : i32
    %c0_i32_0 = arith.constant 0 : i32
    %c0_i32_1 = arith.constant 0 : i32
    return %c0_i32, %c0_i32_0 : i32, i32
  }
  func.func @transform_6(%arg0: i32) -> (i32, i32) {
    %c0_i32 = arith.constant 0 : i32
    %c0_i32_0 = arith.constant 0 : i32
    %c0_i32_1 = arith.constant 0 : i32
    return %c0_i32, %c0_i32_0 : i32, i32
  }
  func.func @transform_7(%arg0: i32) -> (i32, i32) {
    %c0_i32 = arith.constant 0 : i32
    %c0_i32_0 = arith.constant 0 : i32
    %c0_i32_1 = arith.constant 0 : i32
    return %c0_i32, %c0_i32_0 : i32, i32
  }
  func.func @transform_8(%arg0: i32) -> (i32, i32) {
    %c0_i32 = arith.constant 0 : i32
    %c0_i32_0 = arith.constant 0 : i32
    %c0_i32_1 = arith.constant 0 : i32
    return %c0_i32, %c0_i32_0 : i32, i32
  }
  func.func @transform_9(%arg0: i32) -> (i32, i32) {
    %c0_i32 = arith.constant 0 : i32
    %c0_i32_0 = arith.constant 0 : i32
    %c0_i32_1 = arith.constant 0 : i32
    return %c0_i32, %c0_i32_0 : i32, i32
  }
}

</mosaic_0001>

<bundles_post_ra>
// kernel: tpu_custom_call.1
= control target key start
LH: loop header
LB: loop body
LE: loop exit
PB: predicated region body
PF: predicated region fallthrough
CT: control target
= control target key end

     0   :  { %14 = vsyncpa [#allocation7], 0  ;;  %s4232_s0 = inlined_call_operand.vmem [shape: f32[64,16], index: 0, kind: input, shape index: {}]   ;;  %s4233_s1 = inlined_call_operand.vmem [shape: f32[16,512], index: 1, kind: input, shape index: {}]   ;;  %s4234_s2 = inlined_call_operand.hbm [shape: f32[128,512], index: 2, kind: input, shape index: {}]   ;;  %s4235_s3 = inlined_call_operand.vmem [shape: f32[1,512], index: 3, kind: input, shape index: {}]   ;;  %s4236_s4 = inlined_call_operand.hbm [shape: f32[128,512], index: 4, kind: input, shape index: {}]   ;;  %s4237_s5 = inlined_call_operand.hbm [shape: f32[128,512], index: 5, kind: input, shape index: {}]   ;;  %s4238_s6 = inlined_call_operand.vmem [shape: f32[1,512], index: 6, kind: input, shape index: {}]   ;;  %s4239_s7 = inlined_call_operand.vmem [shape: f32[128,8], index: 7, kind: input, shape index: {}]   ;;  %s4240_s8 = inlined_call_operand.vmem [shape: f32[1,8], index: 8, kind: input, shape index: {}]   ;;  %s4241_s9 = inlined_call_operand.hbm [shape: f32[8,8], index: 9, kind: output, shape index: {}]  }
   0x1   :  { %15 = vsyncpa [#allocation10], 0 }
   0x2   :  { %16 = vsyncpa [#allocation8], 0  ;;  %s3092_s30 = smov 0  }
   0x3 LB: > { %s3098_s10 = sadd.s32 4294967295, %s3030_s30   ;;  %p2628_p0 = scmp.ge.s32.totalorder %s3030_s30, 1  ;;  %s3030_s30 = sphi %s3092_s30, %s22_s30  }
   0x4   : > { %p242_p1 = scmp.lt.s32.totalorder %s3030_s30, 3  ;;  %p2756_p3 = scmp.eq.s32.totalorder %s3098_s10, 0 }
   0x5   : > { %s3032_s12 = smov [#allocation9]   ;;  %s3033_s14 = smov [#allocation6]  }
   0x6   : > { %p3104_p4 = pnand %p2628_p0, %p242_p1  ;;  %s273_s13 = sshll.u32 %s3032_s12, 4  ;;  %s274_s13 = int_to_ptr.vmem [resolvable:$true] %s273_s13 }
   0x7   : > { %s257_s15 = sshll.u32 %s3033_s14, 4  ;;  %s3034_s17 = smov [#allocation11]   ;;  %s258_s15 = int_to_ptr.vmem [resolvable:$true] %s257_s15 }
   0x8   : > { %p2746_p5 = pneg %p3104_p4  ;;  %s286_s18 = sshll.u32 %s3034_s17, 4  ;;  %s3116_s18 = int_to_ptr.vmem [resolvable:$true] %s286_s18 }
   0x9   : > { %s2921_s19 = scalar_lea.vmem %s274_s13, 8192  ;;  %p2929_p11 = scmp.lt.s32.totalorder %s274_s13, %s274_s13 }
   0xa   : > { %p3112_p6 = pnand %p2756_p3, %p2746_p5  ;;  %p2922_p8 = scmp.ne.s32.totalorder %s274_s13, %s2921_s19 }
   0xb   : > { %p2930_p12 = scmp.lt.s32.totalorder %s2921_s19, %s2921_s19 }
   0xc   : > { %p2912_p7 = pneg %p3112_p6 }
   0xd   : > { %p2931_p13 = por %p2930_p12, %p2929_p11 }
   0xe   : > { %p2924_p9 = pnand %p2922_p8, %p2912_p7 }
  0x10   : > { %p2925_p10 = pneg %p2924_p9 }
  0x12   : > { %p2932_p0 = pnand %p2931_p13, %p2925_p10 }
  0x14   : > { %2935 = shalt.err (!%p2932_p0)
}
  0x15   : > { %s3035_s20 = smov 512   ;;  %s3036_s21 = smov 32  }
  0x16   : > { %2752 = dma.hbm_to_vmem [thread:$0]  (!%p3112_p6), %s4236_s4, 8192, %s274_s13, [#allocation10], %s3035_s20, %s3035_s20, %s3036_s21  }
  0x17   : > { %s2947_s24 = scalar_lea.vmem %s258_s15, 8192  ;;  %p2955_p9 = scmp.lt.s32.totalorder %s258_s15, %s258_s15 }
  0x18   : > { %p2948_p1 = scmp.ne.s32.totalorder %s258_s15, %s2947_s24  ;;  %p2956_p2 = scmp.lt.s32.totalorder %s2947_s24, %s2947_s24 }
  0x1a   : > { %p2950_p5 = pnand %p2948_p1, %p2912_p7  ;;  %p2957_p11 = por %p2956_p2, %p2955_p9 }
  0x1c   : > { %p2951_p8 = pneg %p2950_p5 }
  0x1e   : > { %p2958_p10 = pnand %p2957_p11, %p2951_p8 }
  0x20   : > { %2961 = shalt.err (!%p2958_p10)
}
  0x21   : > { %2749 = dma.hbm_to_vmem [thread:$0]  (!%p3112_p6), %s4234_s2, 8192, %s258_s15, [#allocation7], %s3035_s20, %s3035_s20, %s3036_s21  }
  0x22   : > { %s2973_s27 = scalar_lea.vmem %s3116_s18, 8192  ;;  %p2981_p2 = scmp.lt.s32.totalorder %s3116_s18, %s3116_s18 }
  0x23   : > { %p2974_p12 = scmp.ne.s32.totalorder %s3116_s18, %s2973_s27  ;;  %p2982_p1 = scmp.lt.s32.totalorder %s2973_s27, %s2973_s27 }
  0x25   : > { %p2976_p13 = pnand %p2974_p12, %p2912_p7  ;;  %p2983_p5 = por %p2982_p1, %p2981_p2 }
  0x27   : > { %p2977_p0 = pneg %p2976_p13 }
  0x29   : > { %p2984_p8 = pnand %p2983_p5, %p2977_p0 }
  0x2b   : > { %2987 = shalt.err (!%p2984_p8)
}
  0x2c   : > { %2755 = dma.hbm_to_vmem [thread:$0]  (!%p3112_p6), %s4237_s5, 8192, %s3116_s18, [#allocation10], %s3035_s20, %s3035_s20, %s3036_s21  }
  0x2d   : > { %320 = sbr.rel (%p3104_p4) target bundleno = 2350 (0x92e), region = 56 }
  0x32   : > { %3017 = dma.done.wait (%p2756_p3), [#allocation7], 8192  }
  0x33   : > { %3019 = vsyncadd (%p2756_p3), [#allocation7], 4294959104 }
  0x34   : > { %3021 = dma.done.wait (%p2756_p3), [#allocation10], 16384  }
  0x35   : > { %3023 = vsyncadd (%p2756_p3), [#allocation10], 4294950912  ;;  %s2637_s12 = sshll.u32 %s3098_s10, 2  ;;  %p4358_p4 = scmp.ne.s32.totalorder %s3098_s10, 0 }
  0x36   : > { %p360_p7 = scmp.lt.s32.totalorder %s2637_s12, 7 }
  0x37   : > { %368 = sbr.rel (%p4358_p4) target bundleno = 63 (0x3f), region = 72 }
  0x38   : > { %s4584_s12 = smov (!%p360_p7, %s2637_s12), 7 }
  0x39   : > { %s2638_s13 = sshll.u32 %s4584_s12, 3 }
  0x3a   : > { %s3163_s15 = scalar_lea.vmem %s4232_s0, %s2638_s13 }
  0x3c   : > { %v3037_v0 = vmov 0.0  }
  0x3d   : > { %369 = vst [vmem:[#allocation2] sm:$0xff] %v3037_v0  ;;  %370 = vst [vmem:[#allocation2 + $0x8] sm:$0xff] %v3037_v0 }
  0x3e   : > { %371 = vst [vmem:[#allocation3 + $0x8] sm:$0xff] %v3037_v0  ;;  %372 = vst [vmem:[#allocation3] sm:$0xff] %v3037_v0 }
  0x3f PF: > { %v378_v1 = vld [vmem:[%s4233_s1 + $0x28] sm:$0xff]  ;;  %v380_v2 = vld [vmem:[%s4233_s1 + $0x38] sm:$0xff]  ;;  %v377_v3 = vld [vmem:[%s4233_s1 + $0x20] sm:$0xff]  ;;  %vm471_vm0 = vcmask 130048   ;;  %v4244_v11 = vmov 0.0   ;;  %p2672_p3 = scmp.ne.s32.totalorder %s3098_s10, 1 }
  0x40   : > { %512 = vmatprep.subr.mxu0 %v378_v1  ;;  %601 = vmatprep.subr.mxu1 %v380_v2  ;;  %v379_v4 = vld [vmem:[%s4233_s1 + $0x30] sm:$0xff]  ;;  %v374_v5 = vld [vmem:[%s4233_s1 + $0x8] sm:$0xff]  ;;  %v376_v6 = vld [vmem:[%s4233_s1 + $0x18] sm:$0xff] }
  0x41   : > { %513 = vmatpush1.msra.mxu0 %v377_v3  ;;  %602 = vmatpush1.msra.mxu1 %v379_v4  ;;  %v373_v7 = vld [vmem:[%s4233_s1] sm:$0xff]  ;;  %v375_v8 = vld [vmem:[%s4233_s1 + $0x10] sm:$0xff]  ;;  %v3192_v10 = vld [vmem:[#allocation6 + $0x1e8] sm:$0xff] }
  0x42   : > { %v446_v9 = vld [vmem:[%s3163_s15] sm:$0xff]  ;;  %514 = vmatprep.subr.mxu0 %v374_v5  ;;  %603 = vmatprep.subr.mxu1 %v376_v6  ;;  %4359 = vst [vmem:[#allocation16_spill] sm:$0xff] %v3192_v10  ;;  %v3195_v12 = vld [vmem:[#allocation6 + $0x1f8] sm:$0xff]  ;;  %v3200_v14 = vld [vmem:[#allocation6 + $0x1f0] sm:$0xff] }
  0x43   : > { %515 = vmatpush1.msra.mxu0 %v373_v7  ;;  %548 = vmatprep.mubr.f32.mxu0 %v4244_v11  ;;  %4360 = vst [vmem:[#allocation17_spill] sm:$0xff] %v3195_v12  ;;  %v3198_v13 = vld [vmem:[#allocation6 + $0x1e0] sm:$0xff]  ;;  %v3204_v15 = vld [vmem:[#allocation6 + $0x1c8] sm:$0xff]  ;;  %v3206_v16 = vld [vmem:[#allocation6 + $0x1d8] sm:$0xff] }
  0x44   : > { %604 = vmatpush1.msra.mxu1 %v375_v8  ;;  %2640 = vmatmul.mubr.msk.f32.vlgmr.msra.gmra.mxu0 %vm471_vm0, %v446_v9  ;;  %v3210_v17 = vld [vmem:[#allocation6 + $0x1c0] sm:$0xff]  ;;  %v3212_v18 = vld [vmem:[#allocation6 + $0x1d0] sm:$0xff]  ;;  %v3216_v19 = vld [vmem:[#allocation6 + $0x1a8] sm:$0xff] }
  0x45   : > { %637 = vmatprep.mubr.f32.mxu1 %v4244_v11  ;;  %687 = vmatprep.subr.mxu0 %v3192_v10  ;;  %v3218_v20 = vld [vmem:[#allocation6 + $0x1b8] sm:$0xff]  ;;  %v3222_v21 = vld [vmem:[#allocation6 + $0x1a0] sm:$0xff]  ;;  %v3224_v22 = vld [vmem:[#allocation6 + $0x1b0] sm:$0xff] }
  0x46   : > { %758 = vmatprep.subr.mxu1 %v3195_v12  ;;  %2644 = vmatmul.mubr.msk.f32.vlgmr.msra.gmra.mxu1 %vm471_vm0, %v446_v9  ;;  %v3228_v23 = vld [vmem:[#allocation6 + $0x188] sm:$0xff]  ;;  %v3230_v24 = vld [vmem:[#allocation6 + $0x198] sm:$0xff]  ;;  %v3234_v25 = vld [vmem:[#allocation6 + $0x180] sm:$0xff] }
  0x47   : > { %688 = vmatpush1.msra.mxu0 %v3198_v13  ;;  %759 = vmatpush1.msra.mxu1 %v3200_v14  ;;  %v3236_v26 = vld [vmem:[#allocation6 + $0x190] sm:$0xff]  ;;  %v3240_v27 = vld [vmem:[#allocation6 + $0x168] sm:$0xff]  ;;  %v3242_v28 = vld [vmem:[#allocation6 + $0x178] sm:$0xff] }
  0x48   : > { %689 = vmatprep.subr.mxu0 %v3204_v15  ;;  %760 = vmatprep.subr.mxu1 %v3206_v16  ;;  %v3246_v29 = vld [vmem:[#allocation6 + $0x160] sm:$0xff]  ;;  %v3248_v30 = vld [vmem:[#allocation6 + $0x170] sm:$0xff]  ;;  %v3252_v31 = vld [vmem:[#allocation6 + $0x148] sm:$0xff] }
  0x49   : > { %690 = vmatpush1.msra.mxu0 %v3210_v17  ;;  %761 = vmatpush1.msra.mxu1 %v3212_v18  ;;  %v3254_v32 = vld [vmem:[#allocation6 + $0x158] sm:$0xff]  ;;  %v3258_v33 = vld [vmem:[#allocation6 + $0x140] sm:$0xff]  ;;  %v3260_v34 = vld [vmem:[#allocation6 + $0x150] sm:$0xff] }
  0x4a   : > { %691 = vmatprep.subr.mxu0 %v3216_v19  ;;  %762 = vmatprep.subr.mxu1 %v3218_v20  ;;  %v3264_v35 = vld [vmem:[#allocation6 + $0x128] sm:$0xff]  ;;  %v3266_v36 = vld [vmem:[#allocation6 + $0x138] sm:$0xff]  ;;  %v3270_v37 = vld [vmem:[#allocation6 + $0x120] sm:$0xff] }
  0x4b   : > { %692 = vmatpush1.msra.mxu0 %v3222_v21  ;;  %763 = vmatpush1.msra.mxu1 %v3224_v22  ;;  %v3272_v38 = vld [vmem:[#allocation6 + $0x130] sm:$0xff]  ;;  %v3276_v39 = vld [vmem:[#allocation6 + $0x108] sm:$0xff]  ;;  %v3278_v40 = vld [vmem:[#allocation6 + $0x118] sm:$0xff] }
  0x4c   : > { %693 = vmatprep.subr.mxu0 %v3228_v23  ;;  %764 = vmatprep.subr.mxu1 %v3230_v24  ;;  %v3282_v41 = vld [vmem:[#allocation6 + $0x100] sm:$0xff]  ;;  %v3284_v42 = vld [vmem:[#allocation6 + $0x110] sm:$0xff]  ;;  %v3288_v43 = vld [vmem:[#allocation6 + $0xe8] sm:$0xff] }
  0x4d   : > { %694 = vmatpush1.msra.mxu0 %v3234_v25  ;;  %765 = vmatpush1.msra.mxu1 %v3236_v26  ;;  %v3290_v44 = vld [vmem:[#allocation6 + $0xf8] sm:$0xff]  ;;  %v3294_v45 = vld [vmem:[#allocation6 + $0xe0] sm:$0xff]  ;;  %v3298_v46 = vld [vmem:[#allocation6 + $0xf0] sm:$0xff] }
  0x4e   : > { %695 = vmatprep.subr.mxu0 %v3240_v27  ;;  %766 = vmatprep.subr.mxu1 %v3242_v28  ;;  %v447_v47 = vld [vmem:[%s3163_s15 + $0x8] sm:$0xff]  ;;  %v3305_v49 = vld [vmem:[#allocation6 + $0xd8] sm:$0xff]  ;;  %v3309_v50 = vld [vmem:[#allocation6 + $0xc0] sm:$0xff] }
  0x4f   : > { %696 = vmatpush1.msra.mxu0 %v3246_v29  ;;  %767 = vmatpush1.msra.mxu1 %v3248_v30  ;;  %v3303_v48 = vld [vmem:[#allocation6 + $0xc8] sm:$0xff]  ;;  %v3313_v51 = vld [vmem:[#allocation6 + $0xd0] sm:$0xff]  ;;  %v3319_v53 = vld [vmem:[#allocation6 + $0xb8] sm:$0xff] }
  0x50   : > { %697 = vmatprep.subr.mxu0 %v3252_v31  ;;  %768 = vmatprep.subr.mxu1 %v3254_v32  ;;  %v3315_v52 = vld [vmem:[#allocation6 + $0xa8] sm:$0xff]  ;;  %4362 = vst [vmem:[#allocation19_spill] sm:$0xff] %v3319_v53  ;;  %v3323_v54 = vld [vmem:[#allocation6 + $0xa0] sm:$0xff]  ;;  %v3327_v55 = vld [vmem:[#allocation6 + $0xb0] sm:$0xff] }
  0x51   : > { %698 = vmatpush1.msra.mxu0 %v3258_v33  ;;  %769 = vmatpush1.msra.mxu1 %v3260_v34  ;;  %4361 = vst [vmem:[#allocation18_spill] sm:$0xff] %v3315_v52  ;;  %4363 = vst [vmem:[#allocation20_spill] sm:$0xff] %v3323_v54  ;;  %v448_v56 = vld [vmem:[%s3163_s15 + $0x10] sm:$0xff]  ;;  %v3332_v57 = vld [vmem:[#allocation6 + $0x88] sm:$0xff] }
  0x52   : > { %699 = vmatprep.subr.mxu0 %v3264_v35  ;;  %770 = vmatprep.subr.mxu1 %v3266_v36  ;;  %4364 = vst [vmem:[#allocation21_spill] sm:$0xff] %v3327_v55  ;;  %4365 = vst [vmem:[#allocation22_spill] sm:$0xff] %v3332_v57  ;;  %v3334_v58 = vld [vmem:[#allocation6 + $0x98] sm:$0xff]  ;;  %v3338_v59 = vld [vmem:[#allocation6 + $0x80] sm:$0xff] }
  0x53   : > { %700 = vmatpush1.msra.mxu0 %v3270_v37  ;;  %771 = vmatpush1.msra.mxu1 %v3272_v38  ;;  %4366 = vst [vmem:[#allocation23_spill] sm:$0xff] %v3334_v58  ;;  %4367 = vst [vmem:[#allocation24_spill] sm:$0xff] %v3338_v59  ;;  %v3342_v60 = vld [vmem:[#allocation6 + $0x90] sm:$0xff]  ;;  %v3344_v61 = vld [vmem:[#allocation6 + $0x68] sm:$0xff] }
  0x54   : > { %701 = vmatprep.subr.mxu0 %v3276_v39  ;;  %772 = vmatprep.subr.mxu1 %v3278_v40  ;;  %4368 = vst [vmem:[#allocation25_spill] sm:$0xff] %v3342_v60  ;;  %4369 = vst [vmem:[#allocation26_spill] sm:$0xff] %v3344_v61  ;;  %v3348_v62 = vld [vmem:[#allocation6 + $0x78] sm:$0xff]  ;;  %v3352_v63 = vld [vmem:[#allocation6 + $0x60] sm:$0xff] }
  0x55   : > { %702 = vmatpush1.msra.mxu0 %v3282_v41  ;;  %773 = vmatpush1.msra.mxu1 %v3284_v42  ;;  %4370 = vst [vmem:[#allocation27_spill] sm:$0xff] %v3348_v62  ;;  %4371 = vst [vmem:[#allocation28_spill] sm:$0xff] %v3352_v63  ;;  %v3356_v0 = vld [vmem:[#allocation6 + $0x70] sm:$0xff]  ;;  %v449_v1 = vld [vmem:[%s3163_s15 + $0x18] sm:$0xff] }
  0x56   : > { %703 = vmatprep.subr.mxu0 %v3288_v43  ;;  %774 = vmatprep.subr.mxu1 %v3290_v44  ;;  %4372 = vst [vmem:[#allocation29_spill] sm:$0xff] %v3356_v0  ;;  %v3361_v2 = vld [vmem:[#allocation6 + $0x48] sm:$0xff]  ;;  %v3363_v3 = vld [vmem:[#allocation6 + $0x58] sm:$0xff]  ;;  %v3367_v4 = vld [vmem:[#allocation6 + $0x40] sm:$0xff] }
  0x57   : > { %554 = vmatprep.mubr.f32.mxu0 %v4244_v11  ;;  %704 = vmatpush1.msra.mxu0 %v3294_v45  ;;  %4373 = vst [vmem:[#allocation30_spill] sm:$0xff] %v3361_v2  ;;  %4374 = vst [vmem:[#allocation31_spill] sm:$0xff] %v3363_v3  ;;  %v3371_v5 = vld [vmem:[#allocation6 + $0x50] sm:$0xff]  ;;  %v3373_v6 = vld [vmem:[#allocation6 + $0x28] sm:$0xff] }
  0x58   : > { %775 = vmatpush1.msra.mxu1 %v3298_v46  ;;  %2641 = vmatmul.mubr.msk.f32.gmra.mxu0 %vm471_vm0, %v447_v47  ;;  %4375 = vst [vmem:[#allocation32_spill] sm:$0xff] %v3367_v4  ;;  %4376 = vst [vmem:[#allocation33_spill] sm:$0xff] %v3371_v5  ;;  %v3377_v7 = vld [vmem:[#allocation6 + $0x38] sm:$0xff]  ;;  %v3381_v8 = vld [vmem:[#allocation6 + $0x20] sm:$0xff] }
  0x59   : > { %705 = vmatprep.subr.mxu0 %v3303_v48  ;;  %776 = vmatprep.subr.mxu1 %v3305_v49  ;;  %4377 = vst [vmem:[#allocation34_spill] sm:$0xff] %v3373_v6  ;;  %4378 = vst [vmem:[#allocation35_spill] sm:$0xff] %v3377_v7  ;;  %v3383_v9 = vld [vmem:[#allocation6 + $0x30] sm:$0xff] }
  0x5a   : > { %643 = vmatprep.mubr.f32.mxu1 %v4244_v11  ;;  %706 = vmatpush1.msra.mxu0 %v3309_v50  ;;  %4379 = vst [vmem:[#allocation36_spill] sm:$0xff] %v3381_v8  ;;  %4380 = vst [vmem:[#allocation37_spill] sm:$0xff] %v3383_v9 }
  0x5b   : > { %777 = vmatpush1.msra.mxu1 %v3313_v51  ;;  %707 = vmatprep.subr.mxu0 %v3315_v52 }
  0x5c   : > { %2645 = vmatmul.mubr.msk.f32.gmra.mxu1 %vm471_vm0, %v447_v47  ;;  %778 = vmatprep.subr.mxu1 %v3319_v53  ;;  %v3387_v47 = vld [vmem:[#allocation6 + $0x8] sm:$0xff] }
  0x5d   : > { %560 = vmatprep.mubr.f32.mxu0 %v4244_v11  ;;  %708 = vmatpush1.msra.mxu0 %v3323_v54  ;;  %4381 = vst [vmem:[#allocation38_spill] sm:$0xff] %v3387_v47 }
  0x5e   : > { %779 = vmatpush1.msra.mxu1 %v3327_v55  ;;  %2642 = vmatmul.mubr.msk.f32.gmra.mxu0 %vm471_vm0, %v448_v56 }
  0x5f   : > { %709 = vmatprep.subr.mxu0 %v3332_v57  ;;  %780 = vmatprep.subr.mxu1 %v3334_v58 }
  0x60   : > { %649 = vmatprep.mubr.f32.mxu1 %v4244_v11  ;;  %710 = vmatpush1.msra.mxu0 %v3338_v59 }
  0x61   : > { %781 = vmatpush1.msra.mxu1 %v3342_v60  ;;  %711 = vmatprep.subr.mxu0 %v3344_v61 }
  0x62   : > { %2646 = vmatmul.mubr.msk.f32.gmra.mxu1 %vm471_vm0, %v448_v56  ;;  %782 = vmatprep.subr.mxu1 %v3348_v62  ;;  %v3389_v56 = vld [vmem:[#allocation6 + $0x18] sm:$0xff] }
  0x63   : > { %566 = vmatprep.mubr.f32.mxu0 %v4244_v11  ;;  %712 = vmatpush1.msra.mxu0 %v3352_v63  ;;  %4382 = vst [vmem:[#allocation39_spill] sm:$0xff] %v3389_v56 }
  0x64   : > { %783 = vmatpush1.msra.mxu1 %v3356_v0  ;;  %2643 = vmatmul.mubr.msk.f32.gmra.mxu0 %vm471_vm0, %v449_v1 }
  0x65   : > { %713 = vmatprep.subr.mxu0 %v3361_v2  ;;  %784 = vmatprep.subr.mxu1 %v3363_v3  ;;  %v3393_v3 = vld [vmem:[#allocation6] sm:$0xff] }
  0x66   : > { %655 = vmatprep.mubr.f32.mxu1 %v4244_v11  ;;  %714 = vmatpush1.msra.mxu0 %v3367_v4  ;;  %4383 = vst [vmem:[#allocation40_spill] sm:$0xff] %v3393_v3  ;;  %v3397_v11 = vld [vmem:[#allocation6 + $0x10] sm:$0xff] }
  0x67   : > { %785 = vmatpush1.msra.mxu1 %v3371_v5  ;;  %715 = vmatprep.subr.mxu0 %v3373_v6  ;;  %4384 = vst [vmem:[#allocation41_spill] sm:$0xff] %v3397_v11  ;;  %v678_v6 = vld [vmem:[#allocation2] sm:$0xff]  ;;  %v4385_v5 = vmov 0.0  }
  0x68   : > { %2647 = vmatmul.mubr.msk.f32.gmra.mxu1 %vm471_vm0, %v449_v1  ;;  %786 = vmatprep.subr.mxu1 %v3377_v7  ;;  %v4386_v1 = vld [vmem:[#allocation31_spill] sm:$0xff] }
  0x69   : > { %716 = vmatpush1.msra.mxu0 %v3381_v8  ;;  %787 = vmatpush1.msra.mxu1 %v3383_v9 }
  0x6a   : > { %717 = vmatprep.subr.mxu0 %v3387_v47  ;;  %788 = vmatprep.subr.mxu1 %v3389_v56 }
  0x6b   : > { %718 = vmatpush1.msra.mxu0 %v3393_v3  ;;  %751 = vmatprep.mubr.f32.mxu0 %v4385_v5 }
  0x6c   : > { %789 = vmatpush1.msra.mxu1 %v3397_v11  ;;  %822 = vmatprep.mubr.f32.mxu1 %v4385_v5 }
  0x6d   : > { %752 = vmatmul.mubr.f32.vlgmr.msra.gmra.mxu0 %v678_v6  ;;  %823 = vmatmul.mubr.f32.vlgmr.msra.gmra.mxu1 %v678_v6  ;;  %v4387_v6 = vld [vmem:[#allocation33_spill] sm:$0xff] }
  0x6e   : > { %865 = vmatprep.subr.mxu0 %v3192_v10  ;;  %936 = vmatprep.subr.mxu1 %v3195_v12 }
  0x6f   : > { %866 = vmatpush1.msra.mxu0 %v3198_v13  ;;  %937 = vmatpush1.msra.mxu1 %v3200_v14 }
  0x70   : > { %867 = vmatprep.subr.mxu0 %v3204_v15  ;;  %938 = vmatprep.subr.mxu1 %v3206_v16 }
  0x71   : > { %868 = vmatpush1.msra.mxu0 %v3210_v17  ;;  %939 = vmatpush1.msra.mxu1 %v3212_v18 }
  0x72   : > { %869 = vmatprep.subr.mxu0 %v3216_v19  ;;  %940 = vmatprep.subr.mxu1 %v3218_v20 }
  0x73   : > { %870 = vmatpush1.msra.mxu0 %v3222_v21  ;;  %941 = vmatpush1.msra.mxu1 %v3224_v22 }
  0x74   : > { %871 = vmatprep.subr.mxu0 %v3228_v23  ;;  %942 = vmatprep.subr.mxu1 %v3230_v24 }
  0x75   : > { %872 = vmatpush1.msra.mxu0 %v3234_v25  ;;  %943 = vmatpush1.msra.mxu1 %v3236_v26 }
  0x76   : > { %873 = vmatprep.subr.mxu0 %v3240_v27  ;;  %944 = vmatprep.subr.mxu1 %v3242_v28 }
  0x77   : > { %874 = vmatpush1.msra.mxu0 %v3246_v29  ;;  %945 = vmatpush1.msra.mxu1 %v3248_v30 }
  0x78   : > { %875 = vmatprep.subr.mxu0 %v3252_v31  ;;  %946 = vmatprep.subr.mxu1 %v3254_v32 }
  0x79   : > { %876 = vmatpush1.msra.mxu0 %v3258_v33  ;;  %947 = vmatpush1.msra.mxu1 %v3260_v34 }
  0x7a   : > { %877 = vmatprep.subr.mxu0 %v3264_v35  ;;  %948 = vmatprep.subr.mxu1 %v3266_v36 }
  0x7b   : > { %878 = vmatpush1.msra.mxu0 %v3270_v37  ;;  %949 = vmatpush1.msra.mxu1 %v3272_v38 }
  0x7c   : > { %879 = vmatprep.subr.mxu0 %v3276_v39  ;;  %950 = vmatprep.subr.mxu1 %v3278_v40 }
  0x7d   : > { %880 = vmatpush1.msra.mxu0 %v3282_v41  ;;  %951 = vmatpush1.msra.mxu1 %v3284_v42 }
  0x7e   : > { %881 = vmatprep.subr.mxu0 %v3288_v43  ;;  %952 = vmatprep.subr.mxu1 %v3290_v44 }
  0x7f   : > { %882 = vmatpush1.msra.mxu0 %v3294_v45  ;;  %953 = vmatpush1.msra.mxu1 %v3298_v46 }
  0x80   : > { %883 = vmatprep.subr.mxu0 %v3303_v48  ;;  %954 = vmatprep.subr.mxu1 %v3305_v49 }
  0x81   : > { %884 = vmatpush1.msra.mxu0 %v3309_v50  ;;  %955 = vmatpush1.msra.mxu1 %v3313_v51 }
  0x82   : > { %885 = vmatprep.subr.mxu0 %v3315_v52  ;;  %956 = vmatprep.subr.mxu1 %v3319_v53 }
  0x83   : > { %886 = vmatpush1.msra.mxu0 %v3323_v54  ;;  %957 = vmatpush1.msra.mxu1 %v3327_v55 }
  0x84   : > { %887 = vmatprep.subr.mxu0 %v3332_v57  ;;  %958 = vmatprep.subr.mxu1 %v3334_v58  ;;  %v4388_v58 = vld [vmem:[#allocation34_spill] sm:$0xff] }
  0x85   : > { %888 = vmatpush1.msra.mxu0 %v3338_v59  ;;  %959 = vmatpush1.msra.mxu1 %v3342_v60 }
  0x86   : > { %889 = vmatprep.subr.mxu0 %v3344_v61  ;;  %960 = vmatprep.subr.mxu1 %v3348_v62 }
  0x87   : > { %890 = vmatpush1.msra.mxu0 %v3352_v63  ;;  %961 = vmatpush1.msra.mxu1 %v3356_v0 }
  0x88   : > { %891 = vmatprep.subr.mxu0 %v3361_v2  ;;  %962 = vmatprep.subr.mxu1 %v4386_v1 }
  0x89   : > { %892 = vmatpush1.msra.mxu0 %v3367_v4  ;;  %963 = vmatpush1.msra.mxu1 %v4387_v6 }
  0x8a   : > { %893 = vmatprep.subr.mxu0 %v4388_v58  ;;  %964 = vmatprep.subr.mxu1 %v3377_v7  ;;  %v451_v7 = vlaneseq }
  0x8b   : > { %894 = vmatpush1.msra.mxu0 %v3381_v8  ;;  %965 = vmatpush1.msra.mxu1 %v3383_v9 }
  0x8c   : > { %895 = vmatprep.subr.mxu0 %v3387_v47  ;;  %966 = vmatprep.subr.mxu1 %v3389_v56  ;;  %v3473_v8 = vshrl.u32 %v451_v7, 7 }
  0x8d   : > { %896 = vmatpush1.msra.mxu0 %v3393_v3  ;;  %929 = vmatprep.mubr.f32.mxu0 %v4385_v5  ;;  %v445_v3 = vld [vmem:[%s4235_s3] sm:$0xf] }
  0x8e   : > { %967 = vmatpush1.msra.mxu1 %v3397_v11  ;;  %1000 = vmatprep.mubr.f32.mxu1 %v4385_v5  ;;  %4389 = vst [vmem:[#allocation42_spill] sm:$0xff] %v3473_v8  ;;  %v4279_v47 = vsub.s32 0, %v3473_v8  ;;  %v4288_v58 = vsub.s32 1, %v3473_v8  ;;  %v4296_v1 = vsub.s32 3, %v3473_v8 }
  0x8f   : > { %1044 = vmatprep.subr.mxu0 %v3192_v10  ;;  %1115 = vmatprep.subr.mxu1 %v3195_v12  ;;  %v4293_v10 = vsub.s32 2, %v3473_v8 }
  0x90   : > { %v454_v5 = vrot.slane %v445_v3, %v4279_v47  ;;  %v458_v7 = vrot.slane %v445_v3, %v4288_v58  ;;  %v466_v47 = vrot.slane %v445_v3, %v4296_v1 }
  0x91   : > { %v462_v0 = vrot.slane %v445_v3, %v4293_v10 }
 0x104   : > { %v550_v9 = vpop.f32.mrf.mxu0 }
 0x106   : > { %v639_v56 = vpop.f32.mrf.mxu1  ;;  %v552_v11 = vpop.f32.mrf.mxu0 }
 0x108   : > { %v641_v6 = vpop.f32.mrf.mxu1 }
 0x118   : > { %v556_v12 = vpop.f32.mrf.mxu0 }
 0x119   : > { %v3485_v4 = vadd.f32 %v556_v12, %v454_v5 }
 0x11a   : > { %v558_v2 = vpop.f32.mrf.mxu0 }
 0x11b   : > { %4390 = vst [vmem:[#allocation43_spill] sm:$0xff] %v3485_v4  ;;  %v3490_v63 = vadd.f32 %v558_v2, %v458_v7 }
 0x11c   : > { %v645_v62 = vpop.f32.mrf.mxu1 }
 0x11d   : > { %4391 = vst [vmem:[#allocation44_spill] sm:$0xff] %v3490_v63  ;;  %v3494_v61 = vadd.f32 %v645_v62, %v462_v0 }
 0x11e   : > { %v562_v60 = vpop.f32.mrf.mxu0  ;;  %v647_v59 = vpop.f32.mrf.mxu1 }
 0x11f   : > { %4392 = vst [vmem:[#allocation45_spill] sm:$0xff] %v3494_v61  ;;  %v3496_v57 = vadd.f32 %v562_v60, %v454_v5  ;;  %v3498_v12 = vadd.f32 %v647_v59, %v466_v47 }
 0x120   : > { %v564_v58 = vpop.f32.mrf.mxu0 }
 0x121   : > { %4393 = vst [vmem:[#allocation46_spill] sm:$0xff] %v3496_v57  ;;  %4394 = vst [vmem:[#allocation47_spill] sm:$0xff] %v3498_v12  ;;  %v3500_v4 = vadd.f32 %v564_v58, %v458_v7  ;;  %v551_v58 = vadd.f32 %v550_v9, %v454_v5  ;;  %v553_v12 = vadd.f32 %v552_v11, %v458_v7 }
 0x122   : > { %v651_v55 = vpop.f32.mrf.mxu1 }
 0x123   : > { %4395 = vst [vmem:[#allocation48_spill] sm:$0xff] %v3500_v4  ;;  %v3502_v54 = vadd.f32 %v651_v55, %v462_v0 }
 0x124   : > { %v568_v2 = vpop.f32.mrf.mxu0  ;;  %v653_v10 = vpop.f32.mrf.mxu1 }
 0x125   : > { %4396 = vst [vmem:[#allocation49_spill] sm:$0xff] %v3502_v54  ;;  %v3504_v63 = vadd.f32 %v568_v2, %v454_v5  ;;  %v3506_v8 = vadd.f32 %v653_v10, %v466_v47 }
 0x126   : > { %v570_v62 = vpop.f32.mrf.mxu0 }
 0x127   : > { %4397 = vst [vmem:[#allocation50_spill] sm:$0xff] %v3504_v63  ;;  %4398 = vst [vmem:[#allocation51_spill] sm:$0xff] %v3506_v8  ;;  %v3508_v3 = vadd.f32 %v570_v62, %v458_v7  ;;  %v640_v63 = vadd.f32 %v639_v56, %v462_v0  ;;  %v642_v8 = vadd.f32 %v641_v6, %v466_v47  ;;  %v4405_v7 = vld [vmem:[#allocation20_spill] sm:$0xff] }
 0x128   : > { %v657_v1 = vpop.f32.mrf.mxu1 }
 0x129   : > { %4399 = vst [vmem:[#allocation52_spill] sm:$0xff] %v3508_v3  ;;  %v3510_v60 = vadd.f32 %v657_v1, %v462_v0 }
 0x12a   : > { %v659_v59 = vpop.f32.mrf.mxu1 }
 0x12b   : > { %4400 = vst [vmem:[#allocation53_spill] sm:$0xff] %v3510_v60  ;;  %v3512_v57 = vadd.f32 %v659_v59, %v466_v47 }
 0x12d   : > { %4401 = vst [vmem:[#allocation54_spill] sm:$0xff] %v3512_v57  ;;  %v753_v4 = vpop.f32.mrf.mxu0  ;;  %v824_v10 = vpop.f32.mrf.mxu1 }
 0x12e   : > { %v829_v55 = vadd.f32 %v753_v4, %v551_v58  ;;  %v831_v62 = vadd.f32 %v824_v10, %v640_v63  ;;  %v4409_v58 = vld [vmem:[#allocation24_spill] sm:$0xff]  ;;  %v4412_v10 = vld [vmem:[#allocation27_spill] sm:$0xff] }
 0x12f   : > { %v755_v54 = vpop.f32.mrf.mxu0  ;;  %v826_v3 = vpop.f32.mrf.mxu1 }
 0x130   : > { %v2648_v61 = vmul.f32 -1.442695, %v829_v55  ;;  %v830_v53 = vadd.f32 %v755_v54, %v553_v12  ;;  %v2650_v1 = vmul.f32 -1.442695, %v831_v62  ;;  %v832_v52 = vadd.f32 %v826_v3, %v642_v8  ;;  %v4406_v12 = vld [vmem:[#allocation21_spill] sm:$0xff]  ;;  %v4407_v3 = vld [vmem:[#allocation22_spill] sm:$0xff] }
 0x131   : > { %v4410_v55 = vld [vmem:[#allocation25_spill] sm:$0xff]  ;;  %v4413_v62 = vld [vmem:[#allocation28_spill] sm:$0xff] }
 0x132   : > { %2782 = vpow2.f32 %v2648_v61  ;;  %v2649_v2 = vmul.f32 -1.442695, %v830_v53  ;;  %v679_v61 = vld [vmem:[#allocation3 + $0x8] sm:$0xff] }
 0x134   : > { %2784 = vpow2.f32 %v2649_v2  ;;  %v4411_v2 = vld [vmem:[#allocation26_spill] sm:$0xff] }
 0x135   : > { %2786 = vpow2.f32 %v2650_v1  ;;  %v4414_v1 = vld [vmem:[#allocation29_spill] sm:$0xff] }
 0x13f   : > { %v2783_v60 = vpop.eup %2782 }
 0x140   : > { %v842_v59 = vadd.f32 1.0, %v2783_v60  ;;  %v4408_v60 = vld [vmem:[#allocation23_spill] sm:$0xff] }
 0x141   : > { %v2785_v57 = vpop.eup %2784 }
 0x142   : > { %2788 = vrcp.f32 %v842_v59  ;;  %v843_v11 = vadd.f32 1.0, %v2785_v57  ;;  %v2787_v4 = vpop.eup %2786  ;;  %v4404_v57 = vld [vmem:[#allocation19_spill] sm:$0xff]  ;;  %v4415_v59 = vld [vmem:[#allocation30_spill] sm:$0xff] }
 0x143   : > { %2790 = vtanh.f32 %v832_v52  ;;  %v844_v9 = vadd.f32 1.0, %v2787_v4  ;;  %v4403_v52 = vld [vmem:[#allocation18_spill] sm:$0xff]  ;;  %v4417_v4 = vld [vmem:[#allocation32_spill] sm:$0xff] }
 0x144   : > { %2792 = vrcp.f32 %v843_v11  ;;  %v4416_v11 = vld [vmem:[#allocation31_spill] sm:$0xff] }
 0x145   : > { %2794 = vrcp.f32 %v844_v9  ;;  %v4422_v9 = vld [vmem:[#allocation37_spill] sm:$0xff] }
 0x14f   : > { %v2789_v54 = vpop.eup %2788 }
 0x150   : > { %v2791_v53 = vpop.eup %2790 }
 0x151   : > { %v2793_v5 = vpop.eup %2792  ;;  %v853_v63 = vmul.f32 %v2791_v53, %v2789_v54  ;;  %v4418_v54 = vld [vmem:[#allocation33_spill] sm:$0xff]  ;;  %v4420_v53 = vld [vmem:[#allocation35_spill] sm:$0xff] }
 0x152   : > { %v852_v0 = vmul.f32 %v2793_v5, %v679_v61  ;;  %v2795_v8 = vpop.eup %2794  ;;  %v4419_v61 = vld [vmem:[#allocation34_spill] sm:$0xff]  ;;  %v4421_v5 = vld [vmem:[#allocation36_spill] sm:$0xff] }
 0x154   : > { %v3514_v56 = vadd.f32 %v853_v63, %v852_v0  ;;  %v4423_v0 = vld [vmem:[#allocation38_spill] sm:$0xff]  ;;  %v4424_v63 = vld [vmem:[#allocation39_spill] sm:$0xff] }
 0x156   : > { %2796 = vtanh.f32 %v3514_v56 }
 0x163   : > { %v2797_v47 = vpop.eup %2796 }
 0x164   : > { %v3517_v6 = vmul.f32 %v2797_v47, %v2795_v8  ;;  %v4425_v8 = vld [vmem:[#allocation40_spill] sm:$0xff]  ;;  %v4426_v47 = vmov 0.0  }
 0x166   : > { %4402 = vst [vmem:[#allocation55_spill] sm:$0xff] %v3517_v6  ;;  %930 = vmatmul.mubr.f32.vlgmr.msra.gmra.mxu0 %v3517_v6  ;;  %1001 = vmatmul.mubr.f32.vlgmr.msra.gmra.mxu1 %v3517_v6  ;;  %v4427_v6 = vld [vmem:[#allocation41_spill] sm:$0xff] }
 0x167   : > { %1045 = vmatpush1.msra.mxu0 %v3198_v13  ;;  %1116 = vmatpush1.msra.mxu1 %v3200_v14 }
 0x168   : > { %1046 = vmatprep.subr.mxu0 %v3204_v15  ;;  %1117 = vmatprep.subr.mxu1 %v3206_v16 }
 0x169   : > { %1047 = vmatpush1.msra.mxu0 %v3210_v17  ;;  %1118 = vmatpush1.msra.mxu1 %v3212_v18 }
 0x16a   : > { %1048 = vmatprep.subr.mxu0 %v3216_v19  ;;  %1119 = vmatprep.subr.mxu1 %v3218_v20 }
 0x16b   : > { %1049 = vmatpush1.msra.mxu0 %v3222_v21  ;;  %1120 = vmatpush1.msra.mxu1 %v3224_v22 }
 0x16c   : > { %1050 = vmatprep.subr.mxu0 %v3228_v23  ;;  %1121 = vmatprep.subr.mxu1 %v3230_v24 }
 0x16d   : > { %1051 = vmatpush1.msra.mxu0 %v3234_v25  ;;  %1122 = vmatpush1.msra.mxu1 %v3236_v26 }
 0x16e   : > { %1052 = vmatprep.subr.mxu0 %v3240_v27  ;;  %1123 = vmatprep.subr.mxu1 %v3242_v28 }
 0x16f   : > { %1053 = vmatpush1.msra.mxu0 %v3246_v29  ;;  %1124 = vmatpush1.msra.mxu1 %v3248_v30 }
 0x170   : > { %1054 = vmatprep.subr.mxu0 %v3252_v31  ;;  %1125 = vmatprep.subr.mxu1 %v3254_v32 }
 0x171   : > { %1055 = vmatpush1.msra.mxu0 %v3258_v33  ;;  %1126 = vmatpush1.msra.mxu1 %v3260_v34 }
 0x172   : > { %1056 = vmatprep.subr.mxu0 %v3264_v35  ;;  %1127 = vmatprep.subr.mxu1 %v3266_v36 }
 0x173   : > { %1057 = vmatpush1.msra.mxu0 %v3270_v37  ;;  %1128 = vmatpush1.msra.mxu1 %v3272_v38 }
 0x174   : > { %1058 = vmatprep.subr.mxu0 %v3276_v39  ;;  %1129 = vmatprep.subr.mxu1 %v3278_v40 }
 0x175   : > { %1059 = vmatpush1.msra.mxu0 %v3282_v41  ;;  %1130 = vmatpush1.msra.mxu1 %v3284_v42 }
 0x176   : > { %1060 = vmatprep.subr.mxu0 %v3288_v43  ;;  %1131 = vmatprep.subr.mxu1 %v3290_v44 }
 0x177   : > { %1061 = vmatpush1.msra.mxu0 %v3294_v45  ;;  %1132 = vmatpush1.msra.mxu1 %v3298_v46 }
 0x178   : > { %1062 = vmatprep.subr.mxu0 %v3303_v48  ;;  %1133 = vmatprep.subr.mxu1 %v3305_v49 }
 0x179   : > { %1063 = vmatpush1.msra.mxu0 %v3309_v50  ;;  %1134 = vmatpush1.msra.mxu1 %v3313_v51 }
 0x17a   : > { %1064 = vmatprep.subr.mxu0 %v4403_v52  ;;  %1135 = vmatprep.subr.mxu1 %v4404_v57 }
 0x17b   : > { %1065 = vmatpush1.msra.mxu0 %v4405_v7  ;;  %1136 = vmatpush1.msra.mxu1 %v4406_v12 }
 0x17c   : > { %1066 = vmatprep.subr.mxu0 %v4407_v3  ;;  %1137 = vmatprep.subr.mxu1 %v4408_v60 }
 0x17d   : > { %1067 = vmatpush1.msra.mxu0 %v4409_v58  ;;  %1138 = vmatpush1.msra.mxu1 %v4410_v55 }
 0x17e   : > { %1068 = vmatprep.subr.mxu0 %v4411_v2  ;;  %1139 = vmatprep.subr.mxu1 %v4412_v10 }
 0x17f   : > { %1069 = vmatpush1.msra.mxu0 %v4413_v62  ;;  %1140 = vmatpush1.msra.mxu1 %v4414_v1  ;;  %v4432_v1 = vld [vmem:[#allocation45_spill] sm:$0xff] }
 0x180   : > { %1070 = vmatprep.subr.mxu0 %v4415_v59  ;;  %1141 = vmatprep.subr.mxu1 %v4416_v11 }
 0x181   : > { %1071 = vmatpush1.msra.mxu0 %v4417_v4  ;;  %1142 = vmatpush1.msra.mxu1 %v4418_v54  ;;  %v4428_v54 = vld [vmem:[#allocation16_spill] sm:$0xff] }
 0x182   : > { %1072 = vmatprep.subr.mxu0 %v4419_v61  ;;  %1143 = vmatprep.subr.mxu1 %v4420_v53  ;;  %v4429_v61 = vld [vmem:[#allocation17_spill] sm:$0xff] }
 0x183   : > { %1073 = vmatpush1.msra.mxu0 %v4421_v5  ;;  %1144 = vmatpush1.msra.mxu1 %v4422_v9  ;;  %v4430_v5 = vld [vmem:[#allocation43_spill] sm:$0xff] }
 0x184   : > { %1074 = vmatprep.subr.mxu0 %v4423_v0  ;;  %1145 = vmatprep.subr.mxu1 %v4424_v63  ;;  %v4431_v0 = vld [vmem:[#allocation44_spill] sm:$0xff] }
 0x185   : > { %1075 = vmatpush1.msra.mxu0 %v4425_v8  ;;  %1108 = vmatprep.mubr.f32.mxu0 %v4426_v47 }
 0x186   : > { %1146 = vmatpush1.msra.mxu1 %v4427_v6  ;;  %1179 = vmatprep.mubr.f32.mxu1 %v4426_v47  ;;  %v4433_v47 = vld [vmem:[#allocation47_spill] sm:$0xff] }
 0x187   : > { %1223 = vmatprep.subr.mxu0 %v4428_v54  ;;  %1294 = vmatprep.subr.mxu1 %v4429_v61 }
 0x226   : > { %v931_v53 = vpop.f32.mrf.mxu0  ;;  %v1002_v8 = vpop.f32.mrf.mxu1 }
 0x227   : > { %v1007_v4 = vadd.f32 %v931_v53, %v4430_v5  ;;  %v1009_v62 = vadd.f32 %v1002_v8, %v4432_v1 }
 0x228   : > { %v933_v9 = vpop.f32.mrf.mxu0  ;;  %v1004_v6 = vpop.f32.mrf.mxu1 }
 0x229   : > { %v2651_v11 = vmul.f32 -1.442695, %v1007_v4  ;;  %v1008_v59 = vadd.f32 %v933_v9, %v4431_v0  ;;  %v2653_v10 = vmul.f32 -1.442695, %v1009_v62  ;;  %v1010_v2 = vadd.f32 %v1004_v6, %v4433_v47 }
 0x22b   : > { %2798 = vpow2.f32 %v2651_v11  ;;  %v2652_v63 = vmul.f32 -1.442695, %v1008_v59 }
 0x22d   : > { %2800 = vpow2.f32 %v2652_v63 }
 0x22e   : > { %2802 = vpow2.f32 %v2653_v10 }
 0x22f   : > { %2804 = vtanh.f32 %v1010_v2 }
 0x238   : > { %v2799_v54 = vpop.eup %2798 }
 0x239   : > { %v1020_v55 = vadd.f32 1.0, %v2799_v54  ;;  %v1457_v54 = vld [vmem:[#allocation9 + $0x1e0] sm:$0xff] }
 0x23a   : > { %v2801_v61 = vpop.eup %2800 }
 0x23b   : > { %2806 = vrcp.f32 %v1020_v55  ;;  %v1021_v53 = vadd.f32 1.0, %v2801_v61  ;;  %v2803_v4 = vpop.eup %2802  ;;  %v1459_v61 = vld [vmem:[#allocation9 + $0x1f0] sm:$0xff] }
 0x23c   : > { %v2805_v5 = vpop.eup %2804  ;;  %v1022_v0 = vadd.f32 1.0, %v2803_v4  ;;  %v1456_v4 = vld [vmem:[#allocation9 + $0x1d8] sm:$0xff] }
 0x23d   : > { %2808 = vrcp.f32 %v1021_v53  ;;  %v1454_v53 = vld [vmem:[#allocation9 + $0x1c8] sm:$0xff] }
 0x23e   : > { %2810 = vrcp.f32 %v1022_v0  ;;  %v1449_v0 = vld [vmem:[#allocation9 + $0x1a0] sm:$0xff] }
 0x248   : > { %v2807_v11 = vpop.eup %2806 }
 0x249   : > { %v1031_v59 = vmul.f32 %v2807_v11, %v2805_v5  ;;  %v1453_v5 = vld [vmem:[#allocation9 + $0x1c0] sm:$0xff]  ;;  %v1455_v11 = vld [vmem:[#allocation9 + $0x1d0] sm:$0xff] }
 0x24a   : > { %v2809_v9 = vpop.eup %2808 }
 0x24b   : > { %v1030_v1 = vmul.f32 %v2809_v9, %v3514_v56  ;;  %v2811_v6 = vpop.eup %2810  ;;  %v1452_v9 = vld [vmem:[#allocation9 + $0x1b8] sm:$0xff] }
 0x24d   : > { %v3592_v63 = vadd.f32 %v1031_v59, %v1030_v1  ;;  %v1450_v59 = vld [vmem:[#allocation9 + $0x1a8] sm:$0xff]  ;;  %v1451_v1 = vld [vmem:[#allocation9 + $0x1b0] sm:$0xff] }
 0x24f   : > { %2812 = vtanh.f32 %v3592_v63 }
 0x25c   : > { %v2813_v10 = vpop.eup %2812 }
 0x25d   : > { %v3595_v62 = vmul.f32 %v2813_v10, %v2811_v6  ;;  %v1448_v6 = vld [vmem:[#allocation9 + $0x198] sm:$0xff]  ;;  %v1445_v10 = vld [vmem:[#allocation9 + $0x180] sm:$0xff] }
 0x25f   : > { %1109 = vmatmul.mubr.f32.vlgmr.msra.gmra.mxu0 %v3595_v62  ;;  %1180 = vmatmul.mubr.f32.vlgmr.msra.gmra.mxu1 %v3595_v62 }
 0x260   : > { %1224 = vmatpush1.msra.mxu0 %v3198_v13  ;;  %1295 = vmatpush1.msra.mxu1 %v3200_v14  ;;  %v4434_v13 = vld [vmem:[#allocation25_spill] sm:$0xff]  ;;  %v4435_v14 = vld [vmem:[#allocation26_spill] sm:$0xff] }
 0x261   : > { %1225 = vmatprep.subr.mxu0 %v3204_v15  ;;  %1296 = vmatprep.subr.mxu1 %v3206_v16  ;;  %v4436_v15 = vld [vmem:[#allocation27_spill] sm:$0xff]  ;;  %v4437_v16 = vld [vmem:[#allocation28_spill] sm:$0xff] }
 0x262   : > { %1226 = vmatpush1.msra.mxu0 %v3210_v17  ;;  %1297 = vmatpush1.msra.mxu1 %v3212_v18  ;;  %v4438_v17 = vld [vmem:[#allocation29_spill] sm:$0xff]  ;;  %v4439_v18 = vld [vmem:[#allocation30_spill] sm:$0xff] }
 0x263   : > { %1227 = vmatprep.subr.mxu0 %v3216_v19  ;;  %1298 = vmatprep.subr.mxu1 %v3218_v20  ;;  %v4440_v19 = vld [vmem:[#allocation31_spill] sm:$0xff]  ;;  %v4441_v20 = vld [vmem:[#allocation32_spill] sm:$0xff] }
 0x264   : > { %1228 = vmatpush1.msra.mxu0 %v3222_v21  ;;  %1299 = vmatpush1.msra.mxu1 %v3224_v22  ;;  %v4442_v21 = vld [vmem:[#allocation33_spill] sm:$0xff]  ;;  %v4443_v22 = vld [vmem:[#allocation34_spill] sm:$0xff] }
 0x265   : > { %1229 = vmatprep.subr.mxu0 %v3228_v23  ;;  %1300 = vmatprep.subr.mxu1 %v3230_v24  ;;  %v4444_v23 = vld [vmem:[#allocation35_spill] sm:$0xff]  ;;  %v4445_v24 = vld [vmem:[#allocation36_spill] sm:$0xff] }
 0x266   : > { %1230 = vmatpush1.msra.mxu0 %v3234_v25  ;;  %1301 = vmatpush1.msra.mxu1 %v3236_v26  ;;  %v4446_v25 = vld [vmem:[#allocation37_spill] sm:$0xff]  ;;  %v4447_v26 = vld [vmem:[#allocation38_spill] sm:$0xff] }
 0x267   : > { %1231 = vmatprep.subr.mxu0 %v3240_v27  ;;  %1302 = vmatprep.subr.mxu1 %v3242_v28  ;;  %v4448_v27 = vld [vmem:[#allocation39_spill] sm:$0xff]  ;;  %v4449_v28 = vld [vmem:[#allocation40_spill] sm:$0xff] }
 0x268   : > { %1232 = vmatpush1.msra.mxu0 %v3246_v29  ;;  %1303 = vmatpush1.msra.mxu1 %v3248_v30  ;;  %v4450_v29 = vld [vmem:[#allocation41_spill] sm:$0xff]  ;;  %v4451_v30 = vmov 0.0  }
 0x269   : > { %1233 = vmatprep.subr.mxu0 %v3252_v31  ;;  %1304 = vmatprep.subr.mxu1 %v3254_v32  ;;  %v1458_v31 = vld [vmem:[#allocation9 + $0x1e8] sm:$0xff]  ;;  %v1460_v32 = vld [vmem:[#allocation9 + $0x1f8] sm:$0xff] }
 0x26a   : > { %1234 = vmatpush1.msra.mxu0 %v3258_v33  ;;  %1305 = vmatpush1.msra.mxu1 %v3260_v34  ;;  %v4452_v34 = vld [vmem:[#allocation46_spill] sm:$0xff] }
 0x26b   : > { %1235 = vmatprep.subr.mxu0 %v3264_v35  ;;  %1306 = vmatprep.subr.mxu1 %v3266_v36 }
 0x26c   : > { %1236 = vmatpush1.msra.mxu0 %v3270_v37  ;;  %1307 = vmatpush1.msra.mxu1 %v3272_v38  ;;  %v4453_v38 = vld [vmem:[#allocation48_spill] sm:$0xff] }
 0x26d   : > { %1237 = vmatprep.subr.mxu0 %v3276_v39  ;;  %1308 = vmatprep.subr.mxu1 %v3278_v40 }
 0x26e   : > { %1238 = vmatpush1.msra.mxu0 %v3282_v41  ;;  %1309 = vmatpush1.msra.mxu1 %v3284_v42  ;;  %v4454_v42 = vld [vmem:[#allocation49_spill] sm:$0xff] }
 0x26f   : > { %1239 = vmatprep.subr.mxu0 %v3288_v43  ;;  %1310 = vmatprep.subr.mxu1 %v3290_v44 }
 0x270   : > { %1240 = vmatpush1.msra.mxu0 %v3294_v45  ;;  %1311 = vmatpush1.msra.mxu1 %v3298_v46  ;;  %v4455_v46 = vld [vmem:[#allocation51_spill] sm:$0xff] }
 0x271   : > { %1241 = vmatprep.subr.mxu0 %v3303_v48  ;;  %1312 = vmatprep.subr.mxu1 %v3305_v49 }
 0x272   : > { %1242 = vmatpush1.msra.mxu0 %v3309_v50  ;;  %1313 = vmatpush1.msra.mxu1 %v3313_v51 }
 0x273   : > { %1243 = vmatprep.subr.mxu0 %v4403_v52  ;;  %1314 = vmatprep.subr.mxu1 %v4404_v57 }
 0x274   : > { %1244 = vmatpush1.msra.mxu0 %v4405_v7  ;;  %1315 = vmatpush1.msra.mxu1 %v4406_v12 }
 0x275   : > { %1245 = vmatprep.subr.mxu0 %v4407_v3  ;;  %1316 = vmatprep.subr.mxu1 %v4408_v60 }
 0x276   : > { %1246 = vmatpush1.msra.mxu0 %v4409_v58  ;;  %1317 = vmatpush1.msra.mxu1 %v4434_v13  ;;  %v1447_v13 = vld [vmem:[#allocation9 + $0x190] sm:$0xff] }
 0x277   : > { %1247 = vmatprep.subr.mxu0 %v4435_v14  ;;  %1318 = vmatprep.subr.mxu1 %v4436_v15  ;;  %v1442_v14 = vld [vmem:[#allocation9 + $0x168] sm:$0xff]  ;;  %v1444_v15 = vld [vmem:[#allocation9 + $0x178] sm:$0xff] }
 0x278   : > { %1248 = vmatpush1.msra.mxu0 %v4437_v16  ;;  %1319 = vmatpush1.msra.mxu1 %v4438_v17  ;;  %v1441_v16 = vld [vmem:[#allocation9 + $0x160] sm:$0xff]  ;;  %v1443_v17 = vld [vmem:[#allocation9 + $0x170] sm:$0xff] }
 0x279   : > { %1249 = vmatprep.subr.mxu0 %v4439_v18  ;;  %1320 = vmatprep.subr.mxu1 %v4440_v19  ;;  %v1438_v18 = vld [vmem:[#allocation9 + $0x148] sm:$0xff]  ;;  %v1440_v19 = vld [vmem:[#allocation9 + $0x158] sm:$0xff] }
 0x27a   : > { %1250 = vmatpush1.msra.mxu0 %v4441_v20  ;;  %1321 = vmatpush1.msra.mxu1 %v4442_v21  ;;  %v1437_v20 = vld [vmem:[#allocation9 + $0x140] sm:$0xff]  ;;  %v1439_v21 = vld [vmem:[#allocation9 + $0x150] sm:$0xff] }
 0x27b   : > { %1251 = vmatprep.subr.mxu0 %v4443_v22  ;;  %1322 = vmatprep.subr.mxu1 %v4444_v23  ;;  %v1434_v22 = vld [vmem:[#allocation9 + $0x128] sm:$0xff]  ;;  %v1436_v23 = vld [vmem:[#allocation9 + $0x138] sm:$0xff] }
 0x27c   : > { %1252 = vmatpush1.msra.mxu0 %v4445_v24  ;;  %1323 = vmatpush1.msra.mxu1 %v4446_v25  ;;  %v1433_v24 = vld [vmem:[#allocation9 + $0x120] sm:$0xff]  ;;  %v1435_v25 = vld [vmem:[#allocation9 + $0x130] sm:$0xff] }
 0x27d   : > { %1253 = vmatprep.subr.mxu0 %v4447_v26  ;;  %1324 = vmatprep.subr.mxu1 %v4448_v27  ;;  %v1430_v26 = vld [vmem:[#allocation9 + $0x108] sm:$0xff]  ;;  %v1432_v27 = vld [vmem:[#allocation9 + $0x118] sm:$0xff] }
 0x27e   : > { %1254 = vmatpush1.msra.mxu0 %v4449_v28  ;;  %1325 = vmatpush1.msra.mxu1 %v4450_v29  ;;  %v1429_v28 = vld [vmem:[#allocation9 + $0x100] sm:$0xff]  ;;  %v1431_v29 = vld [vmem:[#allocation9 + $0x110] sm:$0xff] }
 0x27f   : > { %1287 = vmatprep.mubr.f32.mxu0 %v4451_v30  ;;  %1358 = vmatprep.mubr.f32.mxu1 %v4451_v30 }
 0x280   : > { %1551 = vmatprep.subr.mxu0 %v1458_v31  ;;  %1640 = vmatprep.subr.mxu1 %v1460_v32  ;;  %v1426_v31 = vld [vmem:[#allocation9 + $0xe8] sm:$0xff]  ;;  %v1428_v32 = vld [vmem:[#allocation9 + $0xf8] sm:$0xff] }
 0x31f   : > { %v1110_v33 = vpop.f32.mrf.mxu0  ;;  %v1181_v41 = vpop.f32.mrf.mxu1 }
 0x320   : > { %v1186_v35 = vadd.f32 %v1110_v33, %v4452_v34  ;;  %v1188_v43 = vadd.f32 %v1181_v41, %v4454_v42  ;;  %v1425_v33 = vld [vmem:[#allocation9 + $0xe0] sm:$0xff]  ;;  %v1427_v34 = vld [vmem:[#allocation9 + $0xf0] sm:$0xff] }
 0x321   : > { %v1112_v36 = vpop.f32.mrf.mxu0  ;;  %v1183_v44 = vpop.f32.mrf.mxu1  ;;  %v1417_v41 = vld [vmem:[#allocation9 + $0xa0] sm:$0xff]  ;;  %v1419_v42 = vld [vmem:[#allocation9 + $0xb0] sm:$0xff] }
 0x322   : > { %v2654_v37 = vmul.f32 -1.442695, %v1186_v35  ;;  %v1187_v39 = vadd.f32 %v1112_v36, %v4453_v38  ;;  %v2656_v45 = vmul.f32 -1.442695, %v1188_v43  ;;  %v1189_v48 = vadd.f32 %v1183_v44, %v4455_v46  ;;  %v1422_v35 = vld [vmem:[#allocation9 + $0xc8] sm:$0xff]  ;;  %v1424_v36 = vld [vmem:[#allocation9 + $0xd8] sm:$0xff] }
 0x323   : > { %v1423_v38 = vld [vmem:[#allocation9 + $0xd0] sm:$0xff]  ;;  %v1414_v43 = vld [vmem:[#allocation9 + $0x88] sm:$0xff]  ;;  %v1416_v44 = vld [vmem:[#allocation9 + $0x98] sm:$0xff] }
 0x324   : > { %2814 = vpow2.f32 %v2654_v37  ;;  %v2655_v40 = vmul.f32 -1.442695, %v1187_v39  ;;  %v1421_v37 = vld [vmem:[#allocation9 + $0xc0] sm:$0xff]  ;;  %v1418_v39 = vld [vmem:[#allocation9 + $0xa8] sm:$0xff]  ;;  %v1415_v46 = vld [vmem:[#allocation9 + $0x90] sm:$0xff] }
 0x326   : > { %2816 = vpow2.f32 %v2655_v40  ;;  %v1420_v40 = vld [vmem:[#allocation9 + $0xb8] sm:$0xff] }
 0x327   : > { %2818 = vpow2.f32 %v2656_v45  ;;  %v1413_v45 = vld [vmem:[#allocation9 + $0x80] sm:$0xff] }
 0x328   : > { %2820 = vtanh.f32 %v1189_v48  ;;  %v1410_v48 = vld [vmem:[#allocation9 + $0x68] sm:$0xff] }
 0x331   : > { %v2815_v49 = vpop.eup %2814 }
 0x332   : > { %v1199_v50 = vadd.f32 1.0, %v2815_v49  ;;  %v1412_v49 = vld [vmem:[#allocation9 + $0x78] sm:$0xff] }
 0x333   : > { %v2817_v51 = vpop.eup %2816 }
 0x334   : > { %2822 = vrcp.f32 %v1199_v50  ;;  %v1200_v56 = vadd.f32 1.0, %v2817_v51  ;;  %v2819_v52 = vpop.eup %2818  ;;  %v1409_v50 = vld [vmem:[#allocation9 + $0x60] sm:$0xff]  ;;  %v1411_v51 = vld [vmem:[#allocation9 + $0x70] sm:$0xff] }
 0x335   : > { %v2821_v57 = vpop.eup %2820  ;;  %v1201_v60 = vadd.f32 1.0, %v2819_v52  ;;  %v1408_v52 = vld [vmem:[#allocation9 + $0x58] sm:$0xff] }
 0x336   : > { %2824 = vrcp.f32 %v1200_v56  ;;  %v1406_v56 = vld [vmem:[#allocation9 + $0x48] sm:$0xff] }
 0x337   : > { %2826 = vrcp.f32 %v1201_v60  ;;  %v1401_v60 = vld [vmem:[#allocation9 + $0x20] sm:$0xff] }
 0x341   : > { %v2823_v7 = vpop.eup %2822 }
 0x342   : > { %v1210_v12 = vmul.f32 %v2823_v7, %v2821_v57  ;;  %v1405_v57 = vld [vmem:[#allocation9 + $0x40] sm:$0xff]  ;;  %v1407_v7 = vld [vmem:[#allocation9 + $0x50] sm:$0xff] }
 0x343   : > { %v2825_v3 = vpop.eup %2824 }
 0x344   : > { %v1209_v58 = vmul.f32 %v2825_v3, %v3592_v63  ;;  %v2827_v2 = vpop.eup %2826  ;;  %v1446_v63 = vld [vmem:[#allocation9 + $0x188] sm:$0xff]  ;;  %v1404_v3 = vld [vmem:[#allocation9 + $0x38] sm:$0xff] }
 0x346   : > { %v3668_v55 = vadd.f32 %v1210_v12, %v1209_v58  ;;  %v1402_v12 = vld [vmem:[#allocation9 + $0x28] sm:$0xff]  ;;  %v1403_v58 = vld [vmem:[#allocation9 + $0x30] sm:$0xff] }
 0x348   : > { %2828 = vtanh.f32 %v3668_v55 }
 0x355   : > { %v2829_v8 = vpop.eup %2828 }
 0x356   : > { %v3671_v47 = vmul.f32 %v2829_v8, %v2827_v2  ;;  %v1398_v2 = vld [vmem:[#allocation9 + $0x8] sm:$0xff]  ;;  %v1400_v8 = vld [vmem:[#allocation9 + $0x18] sm:$0xff] }
 0x358   : > { %1288 = vmatmul.mubr.f32.vlgmr.msra.gmra.mxu0 %v3671_v47  ;;  %1359 = vmatmul.mubr.f32.vlgmr.msra.gmra.mxu1 %v3671_v47 }
 0x359   : > { %1552 = vmatpush1.msra.mxu0 %v1457_v54  ;;  %1641 = vmatpush1.msra.mxu1 %v1459_v61  ;;  %v1397_v54 = vld [vmem:[#allocation9] sm:$0xff]  ;;  %v1399_v61 = vld [vmem:[#allocation9 + $0x10] sm:$0xff] }
 0x35a   : > { %1553 = vmatprep.subr.mxu0 %v1454_v53  ;;  %1642 = vmatprep.subr.mxu1 %v1456_v4  ;;  %v4456_v53 = vld [vmem:[#allocation55_spill] sm:$0xff]  ;;  %v3689_v4 = vld [vmem:[#allocation11 + $0x1e8] sm:$0xff] }
 0x35b   : > { %1554 = vmatpush1.msra.mxu0 %v1453_v5  ;;  %1643 = vmatpush1.msra.mxu1 %v1455_v11  ;;  %4457 = vst [vmem:[#allocation18_spill] sm:$0xff] %v3689_v4  ;;  %v3691_v5 = vld [vmem:[#allocation11 + $0x1f8] sm:$0xff]  ;;  %v3697_v11 = vld [vmem:[#allocation11 + $0x1f0] sm:$0xff] }
 0x35c   : > { %1555 = vmatprep.subr.mxu0 %v1450_v59  ;;  %1644 = vmatprep.subr.mxu1 %v1452_v9  ;;  %4458 = vst [vmem:[#allocation19_spill] sm:$0xff] %v3691_v5  ;;  %v3703_v59 = vld [vmem:[#allocation11 + $0x1d8] sm:$0xff]  ;;  %v3707_v9 = vld [vmem:[#allocation11 + $0x1c0] sm:$0xff] }
 0x35d   : > { %1556 = vmatpush1.msra.mxu0 %v1449_v0  ;;  %1645 = vmatpush1.msra.mxu1 %v1451_v1  ;;  %v3709_v0 = vld [vmem:[#allocation11 + $0x1d0] sm:$0xff]  ;;  %v3713_v1 = vld [vmem:[#allocation11 + $0x1a8] sm:$0xff] }
 0x35e   : > { %1557 = vmatprep.subr.mxu0 %v1446_v63  ;;  %1646 = vmatprep.subr.mxu1 %v1448_v6  ;;  %v3715_v63 = vld [vmem:[#allocation11 + $0x1b8] sm:$0xff]  ;;  %v3719_v6 = vld [vmem:[#allocation11 + $0x1a0] sm:$0xff] }
 0x35f   : > { %1558 = vmatpush1.msra.mxu0 %v1445_v10  ;;  %1647 = vmatpush1.msra.mxu1 %v1447_v13  ;;  %v3721_v10 = vld [vmem:[#allocation11 + $0x1b0] sm:$0xff]  ;;  %v3725_v13 = vld [vmem:[#allocation11 + $0x188] sm:$0xff] }
 0x360   : > { %1559 = vmatprep.subr.mxu0 %v1442_v14  ;;  %1648 = vmatprep.subr.mxu1 %v1444_v15  ;;  %v3727_v14 = vld [vmem:[#allocation11 + $0x198] sm:$0xff]  ;;  %v3731_v15 = vld [vmem:[#allocation11 + $0x180] sm:$0xff] }
 0x361   : > { %1560 = vmatpush1.msra.mxu0 %v1441_v16  ;;  %1649 = vmatpush1.msra.mxu1 %v1443_v17  ;;  %v3733_v16 = vld [vmem:[#allocation11 + $0x190] sm:$0xff]  ;;  %v3737_v17 = vld [vmem:[#allocation11 + $0x168] sm:$0xff] }
 0x362   : > { %1561 = vmatprep.subr.mxu0 %v1438_v18  ;;  %1650 = vmatprep.subr.mxu1 %v1440_v19  ;;  %v3739_v18 = vld [vmem:[#allocation11 + $0x178] sm:$0xff]  ;;  %v3743_v19 = vld [vmem:[#allocation11 + $0x160] sm:$0xff] }
 0x363   : > { %1562 = vmatpush1.msra.mxu0 %v1437_v20  ;;  %1651 = vmatpush1.msra.mxu1 %v1439_v21  ;;  %v3745_v20 = vld [vmem:[#allocation11 + $0x170] sm:$0xff]  ;;  %v3749_v21 = vld [vmem:[#allocation11 + $0x148] sm:$0xff] }
 0x364   : > { %1563 = vmatprep.subr.mxu0 %v1434_v22  ;;  %1652 = vmatprep.subr.mxu1 %v1436_v23  ;;  %v3751_v22 = vld [vmem:[#allocation11 + $0x158] sm:$0xff]  ;;  %v3755_v23 = vld [vmem:[#allocation11 + $0x140] sm:$0xff] }
 0x365   : > { %1564 = vmatpush1.msra.mxu0 %v1433_v24  ;;  %1653 = vmatpush1.msra.mxu1 %v1435_v25  ;;  %v3757_v24 = vld [vmem:[#allocation11 + $0x150] sm:$0xff]  ;;  %v3761_v25 = vld [vmem:[#allocation11 + $0x128] sm:$0xff] }
 0x366   : > { %1565 = vmatprep.subr.mxu0 %v1430_v26  ;;  %1654 = vmatprep.subr.mxu1 %v1432_v27  ;;  %v3763_v26 = vld [vmem:[#allocation11 + $0x138] sm:$0xff]  ;;  %v3767_v27 = vld [vmem:[#allocation11 + $0x120] sm:$0xff] }
 0x367   : > { %1566 = vmatpush1.msra.mxu0 %v1429_v28  ;;  %1655 = vmatpush1.msra.mxu1 %v1431_v29  ;;  %v3769_v28 = vld [vmem:[#allocation11 + $0x130] sm:$0xff]  ;;  %v3771_v29 = vld [vmem:[#allocation11 + $0x108] sm:$0xff] }
 0x368   : > { %1567 = vmatprep.subr.mxu0 %v1426_v31  ;;  %1656 = vmatprep.subr.mxu1 %v1428_v32  ;;  %v3775_v31 = vld [vmem:[#allocation11 + $0x118] sm:$0xff]  ;;  %v3777_v32 = vld [vmem:[#allocation11 + $0x100] sm:$0xff] }
 0x369   : > { %1568 = vmatpush1.msra.mxu0 %v1425_v33  ;;  %1657 = vmatpush1.msra.mxu1 %v1427_v34  ;;  %v3779_v33 = vld [vmem:[#allocation11 + $0x110] sm:$0xff]  ;;  %v3783_v34 = vld [vmem:[#allocation11 + $0xe8] sm:$0xff] }
 0x36a   : > { %1569 = vmatprep.subr.mxu0 %v1422_v35  ;;  %1658 = vmatprep.subr.mxu1 %v1424_v36  ;;  %v3785_v35 = vld [vmem:[#allocation11 + $0xf8] sm:$0xff]  ;;  %v3787_v36 = vld [vmem:[#allocation11 + $0xe0] sm:$0xff] }
 0x36b   : > { %1570 = vmatpush1.msra.mxu0 %v1421_v37  ;;  %1659 = vmatpush1.msra.mxu1 %v1423_v38  ;;  %v3791_v37 = vld [vmem:[#allocation11 + $0xf0] sm:$0xff]  ;;  %v3793_v38 = vld [vmem:[#allocation11 + $0xc8] sm:$0xff] }
 0x36c   : > { %1571 = vmatprep.subr.mxu0 %v1418_v39  ;;  %1660 = vmatprep.subr.mxu1 %v1420_v40  ;;  %v3795_v39 = vld [vmem:[#allocation11 + $0xd8] sm:$0xff]  ;;  %v3799_v40 = vld [vmem:[#allocation11 + $0xc0] sm:$0xff] }
 0x36d   : > { %1572 = vmatpush1.msra.mxu0 %v1417_v41  ;;  %1661 = vmatpush1.msra.mxu1 %v1419_v42  ;;  %v3801_v41 = vld [vmem:[#allocation11 + $0xd0] sm:$0xff]  ;;  %v3805_v42 = vld [vmem:[#allocation11 + $0xa8] sm:$0xff] }
 0x36e   : > { %1573 = vmatprep.subr.mxu0 %v1414_v43  ;;  %1662 = vmatprep.subr.mxu1 %v1416_v44  ;;  %v3807_v43 = vld [vmem:[#allocation11 + $0xb8] sm:$0xff]  ;;  %v3811_v44 = vld [vmem:[#allocation11 + $0xa0] sm:$0xff] }
 0x36f   : > { %1574 = vmatpush1.msra.mxu0 %v1413_v45  ;;  %1663 = vmatpush1.msra.mxu1 %v1415_v46  ;;  %v3813_v45 = vld [vmem:[#allocation11 + $0xb0] sm:$0xff]  ;;  %v3817_v46 = vld [vmem:[#allocation11 + $0x88] sm:$0xff] }
 0x370   : > { %1575 = vmatprep.subr.mxu0 %v1410_v48  ;;  %1664 = vmatprep.subr.mxu1 %v1412_v49  ;;  %4459 = vst [vmem:[#allocation20_spill] sm:$0xff] %v3813_v45  ;;  %4460 = vst [vmem:[#allocation21_spill] sm:$0xff] %v3817_v46  ;;  %v3819_v48 = vld [vmem:[#allocation11 + $0x98] sm:$0xff]  ;;  %v3823_v49 = vld [vmem:[#allocation11 + $0x80] sm:$0xff] }
 0x371   : > { %1576 = vmatpush1.msra.mxu0 %v1409_v50  ;;  %1665 = vmatpush1.msra.mxu1 %v1411_v51  ;;  %4461 = vst [vmem:[#allocation22_spill] sm:$0xff] %v3819_v48  ;;  %4462 = vst [vmem:[#allocation23_spill] sm:$0xff] %v3823_v49  ;;  %v3825_v50 = vld [vmem:[#allocation11 + $0x90] sm:$0xff]  ;;  %v3829_v51 = vld [vmem:[#allocation11 + $0x68] sm:$0xff] }
 0x372   : > { %1577 = vmatprep.subr.mxu0 %v1406_v56  ;;  %1666 = vmatprep.subr.mxu1 %v1408_v52  ;;  %4463 = vst [vmem:[#allocation24_spill] sm:$0xff] %v3825_v50  ;;  %4464 = vst [vmem:[#allocation16_spill] sm:$0xff] %v3829_v51  ;;  %v3831_v56 = vld [vmem:[#allocation11 + $0x78] sm:$0xff]  ;;  %v3835_v52 = vld [vmem:[#allocation11 + $0x60] sm:$0xff] }
 0x373   : > { %1578 = vmatpush1.msra.mxu0 %v1405_v57  ;;  %1667 = vmatpush1.msra.mxu1 %v1407_v7  ;;  %4465 = vst [vmem:[#allocation17_spill] sm:$0xff] %v3831_v56  ;;  %4466 = vst [vmem:[#allocation43_spill] sm:$0xff] %v3835_v52  ;;  %v3837_v57 = vld [vmem:[#allocation11 + $0x70] sm:$0xff]  ;;  %v3841_v7 = vld [vmem:[#allocation11 + $0x48] sm:$0xff] }
 0x374   : > { %1579 = vmatprep.subr.mxu0 %v1402_v12  ;;  %1668 = vmatprep.subr.mxu1 %v1404_v3  ;;  %4467 = vst [vmem:[#allocation44_spill] sm:$0xff] %v3837_v57  ;;  %4468 = vst [vmem:[#allocation45_spill] sm:$0xff] %v3841_v7  ;;  %v3843_v12 = vld [vmem:[#allocation11 + $0x58] sm:$0xff]  ;;  %v3847_v3 = vld [vmem:[#allocation11 + $0x40] sm:$0xff] }
 0x375   : > { %1580 = vmatpush1.msra.mxu0 %v1401_v60  ;;  %1669 = vmatpush1.msra.mxu1 %v1403_v58  ;;  %4469 = vst [vmem:[#allocation47_spill] sm:$0xff] %v3843_v12  ;;  %4470 = vst [vmem:[#allocation25_spill] sm:$0xff] %v3847_v3  ;;  %v3849_v60 = vld [vmem:[#allocation11 + $0x50] sm:$0xff]  ;;  %v3853_v58 = vld [vmem:[#allocation11 + $0x28] sm:$0xff] }
 0x376   : > { %1581 = vmatprep.subr.mxu0 %v1398_v2  ;;  %1670 = vmatprep.subr.mxu1 %v1400_v8  ;;  %4471 = vst [vmem:[#allocation26_spill] sm:$0xff] %v3849_v60  ;;  %4472 = vst [vmem:[#allocation27_spill] sm:$0xff] %v3853_v58  ;;  %v3855_v2 = vld [vmem:[#allocation11 + $0x38] sm:$0xff]  ;;  %v3859_v8 = vld [vmem:[#allocation11 + $0x20] sm:$0xff] }
 0x377   : > { %1582 = vmatpush1.msra.mxu0 %v1397_v54  ;;  %1615 = vmatprep.mubr.f32.mxu0 %v4451_v30  ;;  %4473 = vst [vmem:[#allocation28_spill] sm:$0xff] %v3855_v2  ;;  %4474 = vst [vmem:[#allocation29_spill] sm:$0xff] %v3859_v8  ;;  %v3861_v54 = vld [vmem:[#allocation11 + $0x30] sm:$0xff] }
 0x378   : > { %1671 = vmatpush1.msra.mxu1 %v1399_v61  ;;  %1704 = vmatprep.mubr.f32.mxu1 %v4451_v30  ;;  %4475 = vst [vmem:[#allocation30_spill] sm:$0xff] %v3861_v54  ;;  %v3865_v61 = vld [vmem:[#allocation11 + $0x8] sm:$0xff] }
 0x379   : > { %1616 = vmatmul.mubr.f32.vlgmr.msra.gmra.mxu0 %v4456_v53  ;;  %1705 = vmatmul.mubr.f32.vlgmr.msra.gmra.mxu1 %v4456_v53  ;;  %4476 = vst [vmem:[#allocation31_spill] sm:$0xff] %v3865_v61  ;;  %v3867_v53 = vld [vmem:[#allocation11 + $0x18] sm:$0xff] }
 0x37a   : > { %1621 = vmatprep.mubr.f32.mxu0 %v4451_v30  ;;  %1710 = vmatprep.mubr.f32.mxu1 %v4451_v30  ;;  %4477 = vst [vmem:[#allocation32_spill] sm:$0xff] %v3867_v53 }
 0x37b   : > { %1753 = vmatprep.subr.mxu0 %v3689_v4  ;;  %1824 = vmatprep.subr.mxu1 %v3691_v5 }
 0x37c   : > { %1825 = vmatpush1.msra.mxu1 %v3697_v11 }
 0x37d   : > { %1622 = vmatmul.mubr.f32.gmra.mxu0 %v3595_v62  ;;  %1711 = vmatmul.mubr.f32.gmra.mxu1 %v3595_v62  ;;  %v3695_v62 = vld [vmem:[#allocation11 + $0x1e0] sm:$0xff] }
 0x37e   : > { %1627 = vmatprep.mubr.f32.mxu0 %v4451_v30  ;;  %1716 = vmatprep.mubr.f32.mxu1 %v4451_v30 }
 0x37f   : > { %1754 = vmatpush1.msra.mxu0 %v3695_v62  ;;  %1826 = vmatprep.subr.mxu1 %v3703_v59 }
 0x380   : > { %1827 = vmatpush1.msra.mxu1 %v3709_v0 }
 0x381   : > { %1628 = vmatmul.mubr.f32.gmra.mxu0 %v3671_v47  ;;  %1717 = vmatmul.mubr.f32.gmra.mxu1 %v3671_v47  ;;  %v3701_v47 = vld [vmem:[#allocation11 + $0x1c8] sm:$0xff] }
 0x382   : > { %1633 = vmatprep.mubr.f32.mxu0 %v4451_v30  ;;  %1722 = vmatprep.mubr.f32.mxu1 %v4451_v30 }
 0x383   : > { %1755 = vmatprep.subr.mxu0 %v3701_v47  ;;  %1828 = vmatprep.subr.mxu1 %v3715_v63 }
 0x384   : > { %1756 = vmatpush1.msra.mxu0 %v3707_v9  ;;  %1829 = vmatpush1.msra.mxu1 %v3721_v10 }
 0x385   : > { %1757 = vmatprep.subr.mxu0 %v3713_v1  ;;  %1830 = vmatprep.subr.mxu1 %v3727_v14 }
 0x386   : > { %1758 = vmatpush1.msra.mxu0 %v3719_v6  ;;  %1831 = vmatpush1.msra.mxu1 %v3733_v16 }
 0x387   : > { %1759 = vmatprep.subr.mxu0 %v3725_v13  ;;  %1832 = vmatprep.subr.mxu1 %v3739_v18 }
 0x388   : > { %1760 = vmatpush1.msra.mxu0 %v3731_v15  ;;  %1833 = vmatpush1.msra.mxu1 %v3745_v20 }
 0x389   : > { %1761 = vmatprep.subr.mxu0 %v3737_v17  ;;  %1834 = vmatprep.subr.mxu1 %v3751_v22 }
 0x38a   : > { %1762 = vmatpush1.msra.mxu0 %v3743_v19  ;;  %1835 = vmatpush1.msra.mxu1 %v3757_v24 }
 0x38b   : > { %1763 = vmatprep.subr.mxu0 %v3749_v21  ;;  %1836 = vmatprep.subr.mxu1 %v3763_v26 }
 0x38c   : > { %1764 = vmatpush1.msra.mxu0 %v3755_v23  ;;  %1837 = vmatpush1.msra.mxu1 %v3769_v28 }
 0x38d   : > { %1765 = vmatprep.subr.mxu0 %v3761_v25  ;;  %1838 = vmatprep.subr.mxu1 %v3775_v31 }
 0x38e   : > { %1766 = vmatpush1.msra.mxu0 %v3767_v27  ;;  %1839 = vmatpush1.msra.mxu1 %v3779_v33 }
 0x38f   : > { %1767 = vmatprep.subr.mxu0 %v3771_v29  ;;  %1840 = vmatprep.subr.mxu1 %v3785_v35 }
 0x390   : > { %1768 = vmatpush1.msra.mxu0 %v3777_v32  ;;  %1841 = vmatpush1.msra.mxu1 %v3791_v37 }
 0x391   : > { %1769 = vmatprep.subr.mxu0 %v3783_v34  ;;  %1842 = vmatprep.subr.mxu1 %v3795_v39 }
 0x392   : > { %1770 = vmatpush1.msra.mxu0 %v3787_v36  ;;  %1843 = vmatpush1.msra.mxu1 %v3801_v41 }
 0x393   : > { %1771 = vmatprep.subr.mxu0 %v3793_v38  ;;  %1844 = vmatprep.subr.mxu1 %v3807_v43 }
 0x394   : > { %1772 = vmatpush1.msra.mxu0 %v3799_v40  ;;  %1845 = vmatpush1.msra.mxu1 %v3813_v45 }
 0x395   : > { %1773 = vmatprep.subr.mxu0 %v3805_v42  ;;  %1846 = vmatprep.subr.mxu1 %v3819_v48 }
 0x396   : > { %1774 = vmatpush1.msra.mxu0 %v3811_v44  ;;  %1847 = vmatpush1.msra.mxu1 %v3825_v50 }
 0x397   : > { %1775 = vmatprep.subr.mxu0 %v3817_v46  ;;  %1848 = vmatprep.subr.mxu1 %v3831_v56 }
 0x398   : > { %1776 = vmatpush1.msra.mxu0 %v3823_v49  ;;  %1849 = vmatpush1.msra.mxu1 %v3837_v57  ;;  %v3871_v57 = vld [vmem:[#allocation11] sm:$0xff] }
 0x399   : > { %1777 = vmatprep.subr.mxu0 %v3829_v51  ;;  %1850 = vmatprep.subr.mxu1 %v3843_v12  ;;  %4478 = vst [vmem:[#allocation33_spill] sm:$0xff] %v3871_v57 }
 0x39a   : > { %1778 = vmatpush1.msra.mxu0 %v3835_v52  ;;  %1851 = vmatpush1.msra.mxu1 %v3849_v60 }
 0x39b   : > { %1779 = vmatprep.subr.mxu0 %v3841_v7  ;;  %1852 = vmatprep.subr.mxu1 %v3855_v2  ;;  %v3873_v7 = vld [vmem:[#allocation11 + $0x10] sm:$0xff] }
 0x39c   : > { %1780 = vmatpush1.msra.mxu0 %v3847_v3  ;;  %4479 = vst [vmem:[#allocation34_spill] sm:$0xff] %v3873_v7  ;;  %1853 = vmatpush1.msra.mxu1 %v3861_v54 }
 0x39d   : > { %1781 = vmatprep.subr.mxu0 %v3853_v58  ;;  %1854 = vmatprep.subr.mxu1 %v3867_v53  ;;  %v4480_v58 = vld [vmem:[#allocation50_spill] sm:$0xff]  ;;  %v4482_v53 = vld [vmem:[#allocation53_spill] sm:$0xff] }
 0x39e   : > { %1782 = vmatpush1.msra.mxu0 %v3859_v8  ;;  %1855 = vmatpush1.msra.mxu1 %v3873_v7  ;;  %v4481_v8 = vld [vmem:[#allocation52_spill] sm:$0xff]  ;;  %v4483_v7 = vld [vmem:[#allocation54_spill] sm:$0xff] }
 0x39f   : > { %1783 = vmatprep.subr.mxu0 %v3865_v61  ;;  %1998 = vmatprep.subr.mxu1 %v3691_v5 }
 0x3a0   : > { %1784 = vmatpush1.msra.mxu0 %v3871_v57 }
 0x3a1   : > { %1927 = vmatprep.subr.mxu0 %v3689_v4 }
 0x418   : > { %v1289_v2 = vpop.f32.mrf.mxu0  ;;  %v1360_v61 = vpop.f32.mrf.mxu1 }
 0x419   : > { %v1365_v60 = vadd.f32 %v1289_v2, %v4480_v58  ;;  %v1367_v56 = vadd.f32 %v1360_v61, %v4482_v53  ;;  %v4489_v53 = vld [vmem:[#allocation44_spill] sm:$0xff] }
 0x41a   : > { %v1291_v3 = vpop.f32.mrf.mxu0  ;;  %v1362_v57 = vpop.f32.mrf.mxu1 }
 0x41b   : > { %v2657_v12 = vmul.f32 -1.442695, %v1365_v60  ;;  %v1366_v52 = vadd.f32 %v1291_v3, %v4481_v8  ;;  %v2659_v51 = vmul.f32 -1.442695, %v1367_v56  ;;  %v1368_v50 = vadd.f32 %v1362_v57, %v4483_v7  ;;  %v4487_v57 = vld [vmem:[#allocation17_spill] sm:$0xff]  ;;  %v4488_v7 = vld [vmem:[#allocation43_spill] sm:$0xff] }
 0x41d   : > { %2830 = vpow2.f32 %v2657_v12  ;;  %v2658_v54 = vmul.f32 -1.442695, %v1366_v52 }
 0x41f   : > { %2832 = vpow2.f32 %v2658_v54 }
 0x420   : > { %2834 = vpow2.f32 %v2659_v51 }
 0x421   : > { %2836 = vtanh.f32 %v1368_v50  ;;  %v4486_v50 = vld [vmem:[#allocation16_spill] sm:$0xff] }
 0x42a   : > { %v2831_v4 = vpop.eup %2830 }
 0x42b   : > { %v1378_v49 = vadd.f32 1.0, %v2831_v4 }
 0x42c   : > { %v2833_v5 = vpop.eup %2832 }
 0x42d   : > { %2838 = vrcp.f32 %v1378_v49  ;;  %v1379_v58 = vadd.f32 1.0, %v2833_v5  ;;  %v2835_v60 = vpop.eup %2834  ;;  %v1746_v5 = vld [vmem:[#allocation2 + $0x8] sm:$0xff] }
 0x42e   : > { %v2837_v3 = vpop.eup %2836  ;;  %v1380_v8 = vadd.f32 1.0, %v2835_v60  ;;  %v4485_v49 = vld [vmem:[#allocation24_spill] sm:$0xff]  ;;  %v4491_v60 = vld [vmem:[#allocation47_spill] sm:$0xff] }
 0x42f   : > { %2840 = vrcp.f32 %v1379_v58  ;;  %v4490_v58 = vld [vmem:[#allocation45_spill] sm:$0xff] }
 0x430   : > { %2842 = vrcp.f32 %v1380_v8  ;;  %v4496_v8 = vld [vmem:[#allocation29_spill] sm:$0xff] }
 0x43a   : > { %v2839_v12 = vpop.eup %2838 }
 0x43b   : > { %v1389_v52 = vmul.f32 %v2839_v12, %v2837_v3  ;;  %v4492_v3 = vld [vmem:[#allocation25_spill] sm:$0xff]  ;;  %v4493_v12 = vld [vmem:[#allocation26_spill] sm:$0xff] }
 0x43c   : > { %v2841_v2 = vpop.eup %2840 }
 0x43d   : > { %v1388_v54 = vmul.f32 %v2841_v2, %v3668_v55  ;;  %v2843_v56 = vpop.eup %2842  ;;  %v4484_v55 = vld [vmem:[#allocation23_spill] sm:$0xff]  ;;  %v4495_v2 = vld [vmem:[#allocation28_spill] sm:$0xff] }
 0x43f   : > { %v1390_v61 = vadd.f32 %v1389_v52, %v1388_v54  ;;  %v4494_v52 = vld [vmem:[#allocation27_spill] sm:$0xff]  ;;  %v4497_v54 = vld [vmem:[#allocation30_spill] sm:$0xff] }
 0x441   : > { %1396 = vst [vmem:[#allocation3 + $0x8] sm:$0xff] %v1390_v61  ;;  %2844 = vtanh.f32 %v1390_v61  ;;  %v4498_v61 = vld [vmem:[#allocation31_spill] sm:$0xff] }
 0x44e   : > { %v2845_v4 = vpop.eup %2844 }
 0x44f   : > { %v1392_v51 = vmul.f32 %v2845_v4, %v2843_v56  ;;  %v4499_v56 = vld [vmem:[#allocation32_spill] sm:$0xff]  ;;  %v4500_v4 = vld [vmem:[#allocation33_spill] sm:$0xff] }
 0x451   : > { %1395 = vst [vmem:[#allocation2] sm:$0xff] %v1392_v51  ;;  %1634 = vmatmul.mubr.f32.gmra.mxu0 %v1392_v51  ;;  %1723 = vmatmul.mubr.f32.gmra.mxu1 %v1392_v51  ;;  %v4501_v51 = vld [vmem:[#allocation34_spill] sm:$0xff] }
 0x452   : > { %1817 = vmatprep.mubr.f32.mxu0 %v4451_v30  ;;  %1888 = vmatprep.mubr.f32.mxu1 %v4451_v30 }
 0x455   : > { %1818 = vmatmul.mubr.f32.vlgmr.msra.gmra.mxu0 %v1746_v5  ;;  %1889 = vmatmul.mubr.f32.vlgmr.msra.gmra.mxu1 %v1746_v5  ;;  %v4502_v5 = vld [vmem:[#allocation18_spill] sm:$0xff] }
 0x456   : > { %1928 = vmatpush1.msra.mxu0 %v3695_v62  ;;  %1999 = vmatpush1.msra.mxu1 %v3697_v11 }
 0x457   : > { %1929 = vmatprep.subr.mxu0 %v3701_v47  ;;  %2000 = vmatprep.subr.mxu1 %v3703_v59 }
 0x458   : > { %1930 = vmatpush1.msra.mxu0 %v3707_v9  ;;  %2001 = vmatpush1.msra.mxu1 %v3709_v0 }
 0x459   : > { %1931 = vmatprep.subr.mxu0 %v3713_v1  ;;  %2002 = vmatprep.subr.mxu1 %v3715_v63 }
 0x45a   : > { %1932 = vmatpush1.msra.mxu0 %v3719_v6  ;;  %2003 = vmatpush1.msra.mxu1 %v3721_v10 }
 0x45b   : > { %1933 = vmatprep.subr.mxu0 %v3725_v13  ;;  %2004 = vmatprep.subr.mxu1 %v3727_v14 }
 0x45c   : > { %1934 = vmatpush1.msra.mxu0 %v3731_v15  ;;  %2005 = vmatpush1.msra.mxu1 %v3733_v16 }
 0x45d   : > { %1935 = vmatprep.subr.mxu0 %v3737_v17  ;;  %2006 = vmatprep.subr.mxu1 %v3739_v18 }
 0x45e   : > { %1936 = vmatpush1.msra.mxu0 %v3743_v19  ;;  %2007 = vmatpush1.msra.mxu1 %v3745_v20 }
 0x45f   : > { %1937 = vmatprep.subr.mxu0 %v3749_v21  ;;  %2008 = vmatprep.subr.mxu1 %v3751_v22 }
 0x460   : > { %1938 = vmatpush1.msra.mxu0 %v3755_v23  ;;  %2009 = vmatpush1.msra.mxu1 %v3757_v24 }
 0x461   : > { %1939 = vmatprep.subr.mxu0 %v3761_v25  ;;  %2010 = vmatprep.subr.mxu1 %v3763_v26 }
 0x462   : > { %1940 = vmatpush1.msra.mxu0 %v3767_v27  ;;  %2011 = vmatpush1.msra.mxu1 %v3769_v28 }
 0x463   : > { %1941 = vmatprep.subr.mxu0 %v3771_v29  ;;  %2012 = vmatprep.subr.mxu1 %v3775_v31 }
 0x464   : > { %1942 = vmatpush1.msra.mxu0 %v3777_v32  ;;  %2013 = vmatpush1.msra.mxu1 %v3779_v33 }
 0x465   : > { %1943 = vmatprep.subr.mxu0 %v3783_v34  ;;  %2014 = vmatprep.subr.mxu1 %v3785_v35 }
 0x466   : > { %1944 = vmatpush1.msra.mxu0 %v3787_v36  ;;  %2015 = vmatpush1.msra.mxu1 %v3791_v37 }
 0x467   : > { %1945 = vmatprep.subr.mxu0 %v3793_v38  ;;  %2016 = vmatprep.subr.mxu1 %v3795_v39 }
 0x468   : > { %1946 = vmatpush1.msra.mxu0 %v3799_v40  ;;  %2017 = vmatpush1.msra.mxu1 %v3801_v41 }
 0x469   : > { %1947 = vmatprep.subr.mxu0 %v3805_v42  ;;  %2018 = vmatprep.subr.mxu1 %v3807_v43 }
 0x46a   : > { %1948 = vmatpush1.msra.mxu0 %v3811_v44  ;;  %2019 = vmatpush1.msra.mxu1 %v3813_v45 }
 0x46b   : > { %1949 = vmatprep.subr.mxu0 %v3817_v46  ;;  %2020 = vmatprep.subr.mxu1 %v3819_v48 }
 0x46c   : > { %1950 = vmatpush1.msra.mxu0 %v4484_v55  ;;  %2021 = vmatpush1.msra.mxu1 %v4485_v49 }
 0x46d   : > { %1951 = vmatprep.subr.mxu0 %v4486_v50  ;;  %2022 = vmatprep.subr.mxu1 %v4487_v57 }
 0x46e   : > { %1952 = vmatpush1.msra.mxu0 %v4488_v7  ;;  %2023 = vmatpush1.msra.mxu1 %v4489_v53 }
 0x46f   : > { %1953 = vmatprep.subr.mxu0 %v4490_v58  ;;  %2024 = vmatprep.subr.mxu1 %v4491_v60 }
 0x470   : > { %1954 = vmatpush1.msra.mxu0 %v4492_v3  ;;  %2025 = vmatpush1.msra.mxu1 %v4493_v12  ;;  %v1706_v12 = vpop.f32.mrf.mxu1 }
 0x471   : > { %1955 = vmatprep.subr.mxu0 %v4494_v52  ;;  %2026 = vmatprep.subr.mxu1 %v4495_v2  ;;  %v4503_v52 = vld [vmem:[#allocation19_spill] sm:$0xff]  ;;  %v1617_v2 = vpop.f32.mrf.mxu0 }
 0x472   : > { %1956 = vmatpush1.msra.mxu0 %v4496_v8  ;;  %2027 = vmatpush1.msra.mxu1 %v4497_v54 }
 0x473   : > { %1957 = vmatprep.subr.mxu0 %v4498_v61  ;;  %2028 = vmatprep.subr.mxu1 %v4499_v56  ;;  %v1619_v8 = vpop.f32.mrf.mxu0  ;;  %v1708_v61 = vpop.f32.mrf.mxu1 }
 0x474   : > { %1958 = vmatpush1.msra.mxu0 %v4500_v4  ;;  %1991 = vmatprep.mubr.f32.mxu0 %v4451_v30 }
 0x475   : > { %2029 = vmatpush1.msra.mxu1 %v4501_v51  ;;  %2062 = vmatprep.mubr.f32.mxu1 %v4451_v30  ;;  %v3956_v54 = vpop.f32.mrf.mxu0  ;;  %v3960_v56 = vpop.f32.mrf.mxu1 }
 0x476   : > { %2101 = vmatprep.subr.mxu0 %v4502_v5  ;;  %2172 = vmatprep.subr.mxu1 %v4503_v52  ;;  %4504 = vst [vmem:[#allocation35_spill] sm:$0xff] %v3956_v54  ;;  %4506 = vst [vmem:[#allocation37_spill] sm:$0xff] %v3960_v56  ;;  %v1525_v5 = vld [vmem:[%s4238_s6] sm:$0xf]  ;;  %v4510_v52 = vld [vmem:[#allocation42_spill] sm:$0xff] }
 0x477   : > { %v3958_v3 = vpop.f32.mrf.mxu0  ;;  %v3964_v60 = vpop.f32.mrf.mxu1  ;;  %v4511_v30 = vsub.s32 0, %v4510_v52  ;;  %v4515_v56 = vsub.s32 1, %v4510_v52  ;;  %v4521_v48 = vsub.s32 2, %v4510_v52 }
 0x478   : > { %4505 = vst [vmem:[#allocation36_spill] sm:$0xff] %v3958_v3  ;;  %4508 = vst [vmem:[#allocation39_spill] sm:$0xff] %v3964_v60 }
 0x479   : > { %v3962_v4 = vpop.f32.mrf.mxu0  ;;  %v3973_v58 = vrot.slane %v1525_v5, %v4511_v30  ;;  %v3975_v54 = vpop.f32.mrf.mxu1  ;;  %v3981_v3 = vrot.slane %v1525_v5, %v4515_v56 }
 0x47a   : > { %4507 = vst [vmem:[#allocation38_spill] sm:$0xff] %v3962_v4  ;;  %4513 = vst [vmem:[#allocation46_spill] sm:$0xff] %v3975_v54 }
 0x47b   : > { %v3969_v51 = vpop.f32.mrf.mxu0  ;;  %4512 = vst [vmem:[#allocation41_spill] sm:$0xff] %v3973_v58  ;;  %4516 = vst [vmem:[#allocation49_spill] sm:$0xff] %v3981_v3  ;;  %v1618_v60 = vadd.f32 %v1617_v2, %v3973_v58  ;;  %v3986_v7 = vpop.f32.mrf.mxu1 }
 0x47c   : > { %4509 = vst [vmem:[#allocation40_spill] sm:$0xff] %v3969_v51  ;;  %4518 = vst [vmem:[#allocation55_spill] sm:$0xff] %v3986_v7  ;;  %v1620_v51 = vadd.f32 %v1619_v8, %v3981_v3  ;;  %v4523_v8 = vsub.s32 3, %v4510_v52 }
 0x47e   : > { %v4000_v3 = vrot.slane %v1525_v5, %v4523_v8 }
 0x511   : > { %v3977_v53 = vpop.f32.mrf.mxu0  ;;  %v3989_v50 = vpop.f32.mrf.mxu1 }
 0x512   : > { %4514 = vst [vmem:[#allocation48_spill] sm:$0xff] %v3977_v53  ;;  %4519 = vst [vmem:[#allocation50_spill] sm:$0xff] %v3989_v50  ;;  %v1748_v50 = vld [vmem:[#allocation3] sm:$0xff] }
 0x513   : > { %v3983_v4 = vpop.f32.mrf.mxu0  ;;  %v3991_v53 = vpop.f32.mrf.mxu1 }
 0x514   : > { %4517 = vst [vmem:[#allocation51_spill] sm:$0xff] %v3983_v4  ;;  %4520 = vst [vmem:[#allocation52_spill] sm:$0xff] %v3991_v53  ;;  %v3995_v4 = vrot.slane %v1525_v5, %v4521_v48 }
 0x515   : > { %v1819_v57 = vpop.f32.mrf.mxu0  ;;  %v1890_v2 = vpop.f32.mrf.mxu1 }
 0x516   : > { %v1895_v30 = vadd.f32 %v1819_v57, %v1618_v60  ;;  %4522 = vst [vmem:[#allocation53_spill] sm:$0xff] %v3995_v4  ;;  %v1707_v7 = vadd.f32 %v1706_v12, %v3995_v4 }
 0x517   : > { %v1821_v49 = vpop.f32.mrf.mxu0  ;;  %v1892_v60 = vpop.f32.mrf.mxu1 }
 0x518   : > { %v2660_v54 = vmul.f32 -1.442695, %v1895_v30  ;;  %v1896_v55 = vadd.f32 %v1821_v49, %v1620_v51  ;;  %v1897_v57 = vadd.f32 %v1890_v2, %v1707_v7  ;;  %v1709_v49 = vadd.f32 %v1708_v61, %v4000_v3 }
 0x51a   : > { %2846 = vpow2.f32 %v2660_v54  ;;  %v2661_v56 = vmul.f32 -1.442695, %v1896_v55  ;;  %v2662_v51 = vmul.f32 -1.442695, %v1897_v57  ;;  %v1898_v54 = vadd.f32 %v1892_v60, %v1709_v49  ;;  %v4526_v49 = vld [vmem:[#allocation24_spill] sm:$0xff] }
 0x51c   : > { %2848 = vpow2.f32 %v2661_v56 }
 0x51d   : > { %2850 = vpow2.f32 %v2662_v51  ;;  %v4527_v51 = vld [vmem:[#allocation16_spill] sm:$0xff] }
 0x527   : > { %v2847_v30 = vpop.eup %2846 }
 0x528   : > { %v1908_v55 = vadd.f32 1.0, %v2847_v30  ;;  %v4528_v30 = vld [vmem:[#allocation17_spill] sm:$0xff] }
 0x529   : > { %v2849_v53 = vpop.eup %2848 }
 0x52a   : > { %2852 = vrcp.f32 %v1908_v55  ;;  %v1909_v48 = vadd.f32 1.0, %v2849_v53  ;;  %v2851_v56 = vpop.eup %2850  ;;  %v4525_v53 = vld [vmem:[#allocation23_spill] sm:$0xff]  ;;  %v4530_v55 = vld [vmem:[#allocation44_spill] sm:$0xff] }
 0x52b   : > { %2854 = vtanh.f32 %v1898_v54  ;;  %v1910_v8 = vadd.f32 1.0, %v2851_v56  ;;  %v4529_v54 = vld [vmem:[#allocation43_spill] sm:$0xff] }
 0x52c   : > { %2856 = vrcp.f32 %v1909_v48  ;;  %v4531_v48 = vld [vmem:[#allocation45_spill] sm:$0xff]  ;;  %v4532_v56 = vld [vmem:[#allocation47_spill] sm:$0xff] }
 0x52d   : > { %2858 = vrcp.f32 %v1910_v8  ;;  %v4536_v8 = vld [vmem:[#allocation28_spill] sm:$0xff] }
 0x537   : > { %v2853_v12 = vpop.eup %2852 }
 0x538   : > { %v2855_v52 = vpop.eup %2854 }
 0x539   : > { %v2857_v5 = vpop.eup %2856  ;;  %v1919_v2 = vmul.f32 %v2855_v52, %v2853_v12  ;;  %v4533_v12 = vld [vmem:[#allocation25_spill] sm:$0xff]  ;;  %v4534_v52 = vld [vmem:[#allocation26_spill] sm:$0xff] }
 0x53a   : > { %v1918_v7 = vmul.f32 %v2857_v5, %v1748_v50  ;;  %v2859_v61 = vpop.eup %2858  ;;  %v4524_v50 = vld [vmem:[#allocation22_spill] sm:$0xff]  ;;  %v4535_v5 = vld [vmem:[#allocation27_spill] sm:$0xff] }
 0x53c   : > { %v4003_v4 = vadd.f32 %v1919_v2, %v1918_v7  ;;  %v4537_v7 = vld [vmem:[#allocation29_spill] sm:$0xff]  ;;  %v4538_v2 = vld [vmem:[#allocation30_spill] sm:$0xff] }
 0x53e   : > { %2860 = vtanh.f32 %v4003_v4 }
 0x54b   : > { %v2861_v57 = vpop.eup %2860 }
 0x54c   : > { %v1922_v60 = vmul.f32 %v2861_v57, %v2859_v61  ;;  %v4539_v61 = vld [vmem:[#allocation31_spill] sm:$0xff]  ;;  %v4540_v57 = vld [vmem:[#allocation32_spill] sm:$0xff] }
 0x54e   : > { %1992 = vmatmul.mubr.f32.vlgmr.msra.gmra.mxu0 %v1922_v60  ;;  %2063 = vmatmul.mubr.f32.vlgmr.msra.gmra.mxu1 %v1922_v60  ;;  %v4541_v60 = vld [vmem:[#allocation33_spill] sm:$0xff] }
 0x54f   : > { %2102 = vmatpush1.msra.mxu0 %v3695_v62  ;;  %2173 = vmatpush1.msra.mxu1 %v3697_v11 }
 0x550   : > { %2103 = vmatprep.subr.mxu0 %v3701_v47  ;;  %2174 = vmatprep.subr.mxu1 %v3703_v59 }
 0x551   : > { %2104 = vmatpush1.msra.mxu0 %v3707_v9  ;;  %2175 = vmatpush1.msra.mxu1 %v3709_v0 }
 0x552   : > { %2105 = vmatprep.subr.mxu0 %v3713_v1  ;;  %2176 = vmatprep.subr.mxu1 %v3715_v63 }
 0x553   : > { %2106 = vmatpush1.msra.mxu0 %v3719_v6  ;;  %2177 = vmatpush1.msra.mxu1 %v3721_v10 }
 0x554   : > { %2107 = vmatprep.subr.mxu0 %v3725_v13  ;;  %2178 = vmatprep.subr.mxu1 %v3727_v14 }
 0x555   : > { %2108 = vmatpush1.msra.mxu0 %v3731_v15  ;;  %2179 = vmatpush1.msra.mxu1 %v3733_v16 }
 0x556   : > { %2109 = vmatprep.subr.mxu0 %v3737_v17  ;;  %2180 = vmatprep.subr.mxu1 %v3739_v18 }
 0x557   : > { %2110 = vmatpush1.msra.mxu0 %v3743_v19  ;;  %2181 = vmatpush1.msra.mxu1 %v3745_v20 }
 0x558   : > { %2111 = vmatprep.subr.mxu0 %v3749_v21  ;;  %2182 = vmatprep.subr.mxu1 %v3751_v22 }
 0x559   : > { %2112 = vmatpush1.msra.mxu0 %v3755_v23  ;;  %2183 = vmatpush1.msra.mxu1 %v3757_v24 }
 0x55a   : > { %2113 = vmatprep.subr.mxu0 %v3761_v25  ;;  %2184 = vmatprep.subr.mxu1 %v3763_v26 }
 0x55b   : > { %2114 = vmatpush1.msra.mxu0 %v3767_v27  ;;  %2185 = vmatpush1.msra.mxu1 %v3769_v28 }
 0x55c   : > { %2115 = vmatprep.subr.mxu0 %v3771_v29  ;;  %2186 = vmatprep.subr.mxu1 %v3775_v31 }
 0x55d   : > { %2116 = vmatpush1.msra.mxu0 %v3777_v32  ;;  %2187 = vmatpush1.msra.mxu1 %v3779_v33 }
 0x55e   : > { %2117 = vmatprep.subr.mxu0 %v3783_v34  ;;  %2188 = vmatprep.subr.mxu1 %v3785_v35 }
 0x55f   : > { %2118 = vmatpush1.msra.mxu0 %v3787_v36  ;;  %2189 = vmatpush1.msra.mxu1 %v3791_v37 }
 0x560   : > { %2119 = vmatprep.subr.mxu0 %v3793_v38  ;;  %2190 = vmatprep.subr.mxu1 %v3795_v39 }
 0x561   : > { %2120 = vmatpush1.msra.mxu0 %v3799_v40  ;;  %2191 = vmatpush1.msra.mxu1 %v3801_v41 }
 0x562   : > { %2121 = vmatprep.subr.mxu0 %v3805_v42  ;;  %2192 = vmatprep.subr.mxu1 %v3807_v43 }
 0x563   : > { %2122 = vmatpush1.msra.mxu0 %v3811_v44  ;;  %2193 = vmatpush1.msra.mxu1 %v3813_v45 }
 0x564   : > { %2123 = vmatprep.subr.mxu0 %v3817_v46  ;;  %2194 = vmatprep.subr.mxu1 %v4524_v50  ;;  %v4551_v50 = vld [vmem:[#allocation39_spill] sm:$0xff] }
 0x565   : > { %2124 = vmatpush1.msra.mxu0 %v4525_v53  ;;  %2195 = vmatpush1.msra.mxu1 %v4526_v49  ;;  %v4550_v49 = vld [vmem:[#allocation37_spill] sm:$0xff] }
 0x566   : > { %2125 = vmatprep.subr.mxu0 %v4527_v51  ;;  %2196 = vmatprep.subr.mxu1 %v4528_v30 }
 0x567   : > { %2126 = vmatpush1.msra.mxu0 %v4529_v54  ;;  %2197 = vmatpush1.msra.mxu1 %v4530_v55 }
 0x568   : > { %2127 = vmatprep.subr.mxu0 %v4531_v48  ;;  %2198 = vmatprep.subr.mxu1 %v4532_v56  ;;  %v4542_v48 = vmov 0.0   ;;  %v4543_v56 = vld [vmem:[#allocation34_spill] sm:$0xff] }
 0x569   : > { %2128 = vmatpush1.msra.mxu0 %v4533_v12  ;;  %2199 = vmatpush1.msra.mxu1 %v4534_v52  ;;  %v4544_v52 = vld [vmem:[#allocation18_spill] sm:$0xff]  ;;  %v4547_v12 = vld [vmem:[#allocation49_spill] sm:$0xff] }
 0x56a   : > { %2129 = vmatprep.subr.mxu0 %v4535_v5  ;;  %2200 = vmatprep.subr.mxu1 %v4536_v8  ;;  %v4545_v5 = vld [vmem:[#allocation19_spill] sm:$0xff] }
 0x56b   : > { %2130 = vmatpush1.msra.mxu0 %v4537_v7  ;;  %2201 = vmatpush1.msra.mxu1 %v4538_v2  ;;  %v4546_v7 = vld [vmem:[#allocation35_spill] sm:$0xff] }
 0x56c   : > { %2131 = vmatprep.subr.mxu0 %v4539_v61  ;;  %2202 = vmatprep.subr.mxu1 %v4540_v57  ;;  %v1624_v8 = vadd.f32 %v4546_v7, %v3973_v58  ;;  %v4548_v61 = vld [vmem:[#allocation36_spill] sm:$0xff]  ;;  %v1715_v7 = vadd.f32 %v4551_v50, %v4000_v3 }
 0x56d   : > { %2132 = vmatpush1.msra.mxu0 %v4541_v60  ;;  %2165 = vmatprep.mubr.f32.mxu0 %v4542_v48  ;;  %v1626_v55 = vadd.f32 %v4548_v61, %v4547_v12 }
 0x56e   : > { %2203 = vmatpush1.msra.mxu1 %v4543_v56  ;;  %2236 = vmatprep.mubr.f32.mxu1 %v4542_v48  ;;  %v4549_v48 = vld [vmem:[#allocation53_spill] sm:$0xff] }
 0x56f   : > { %2275 = vmatprep.subr.mxu0 %v4544_v52  ;;  %2346 = vmatprep.subr.mxu1 %v4545_v5  ;;  %v1713_v52 = vadd.f32 %v4550_v49, %v4549_v48 }
 0x60e   : > { %v1993_v2 = vpop.f32.mrf.mxu0  ;;  %v2064_v56 = vpop.f32.mrf.mxu1 }
 0x60f   : > { %v2069_v57 = vadd.f32 %v1993_v2, %v1624_v8  ;;  %v2071_v53 = vadd.f32 %v2064_v56, %v1713_v52 }
 0x610   : > { %v1995_v54 = vpop.f32.mrf.mxu0  ;;  %v2066_v5 = vpop.f32.mrf.mxu1 }
 0x611   : > { %v2663_v60 = vmul.f32 -1.442695, %v2069_v57  ;;  %v2070_v30 = vadd.f32 %v1995_v54, %v1626_v55  ;;  %v2665_v58 = vmul.f32 -1.442695, %v2071_v53  ;;  %v2072_v46 = vadd.f32 %v2066_v5, %v1715_v7 }
 0x613   : > { %2862 = vpow2.f32 %v2663_v60  ;;  %v2664_v51 = vmul.f32 -1.442695, %v2070_v30 }
 0x615   : > { %2864 = vpow2.f32 %v2664_v51 }
 0x616   : > { %2866 = vpow2.f32 %v2665_v58 }
 0x617   : > { %2868 = vtanh.f32 %v2072_v46 }
 0x620   : > { %v2863_v45 = vpop.eup %2862 }
 0x621   : > { %v2082_v61 = vadd.f32 1.0, %v2863_v45 }
 0x622   : > { %v2865_v8 = vpop.eup %2864 }
 0x623   : > { %2870 = vrcp.f32 %v2082_v61  ;;  %v2083_v54 = vadd.f32 1.0, %v2865_v8  ;;  %v2867_v51 = vpop.eup %2866 }
 0x624   : > { %v2869_v30 = vpop.eup %2868  ;;  %v2084_v56 = vadd.f32 1.0, %v2867_v51 }
 0x625   : > { %2872 = vrcp.f32 %v2083_v54 }
 0x626   : > { %2874 = vrcp.f32 %v2084_v56 }
 0x630   : > { %v2871_v55 = vpop.eup %2870 }
 0x631   : > { %v2093_v2 = vmul.f32 %v2871_v55, %v2869_v30 }
 0x632   : > { %v2873_v49 = vpop.eup %2872 }
 0x633   : > { %v2092_v57 = vmul.f32 %v2873_v49, %v4003_v4  ;;  %v2875_v45 = vpop.eup %2874 }
 0x635   : > { %v4081_v60 = vadd.f32 %v2093_v2, %v2092_v57 }
 0x637   : > { %2876 = vtanh.f32 %v4081_v60 }
 0x644   : > { %v2877_v58 = vpop.eup %2876 }
 0x645   : > { %v2096_v50 = vmul.f32 %v2877_v58, %v2875_v45  ;;  %v4579_v45 = vld [vmem:[#allocation48_spill] sm:$0xff] }
 0x647   : > { %2166 = vmatmul.mubr.f32.vlgmr.msra.gmra.mxu0 %v2096_v50  ;;  %2237 = vmatmul.mubr.f32.vlgmr.msra.gmra.mxu1 %v2096_v50 }
 0x648   : > { %2276 = vmatpush1.msra.mxu0 %v3695_v62  ;;  %2347 = vmatpush1.msra.mxu1 %v3697_v11  ;;  %v4552_v62 = vld [vmem:[#allocation20_spill] sm:$0xff]  ;;  %v4553_v11 = vld [vmem:[#allocation21_spill] sm:$0xff] }
 0x649   : > { %2277 = vmatprep.subr.mxu0 %v3701_v47  ;;  %2348 = vmatprep.subr.mxu1 %v3703_v59  ;;  %v4554_v47 = vld [vmem:[#allocation22_spill] sm:$0xff]  ;;  %v4555_v59 = vld [vmem:[#allocation23_spill] sm:$0xff] }
 0x64a   : > { %2278 = vmatpush1.msra.mxu0 %v3707_v9  ;;  %2349 = vmatpush1.msra.mxu1 %v3709_v0  ;;  %v4556_v9 = vld [vmem:[#allocation24_spill] sm:$0xff] }
 0x64b   : > { %2279 = vmatprep.subr.mxu0 %v3713_v1  ;;  %2350 = vmatprep.subr.mxu1 %v3715_v63  ;;  %v4557_v0 = vld [vmem:[#allocation16_spill] sm:$0xff]  ;;  %v4558_v1 = vld [vmem:[#allocation17_spill] sm:$0xff]  ;;  %v4559_v63 = vld [vmem:[#allocation43_spill] sm:$0xff] }
 0x64c   : > { %2280 = vmatpush1.msra.mxu0 %v3719_v6  ;;  %2351 = vmatpush1.msra.mxu1 %v3721_v10  ;;  %v4560_v6 = vld [vmem:[#allocation44_spill] sm:$0xff]  ;;  %v4561_v10 = vld [vmem:[#allocation45_spill] sm:$0xff] }
 0x64d   : > { %2281 = vmatprep.subr.mxu0 %v3725_v13  ;;  %2352 = vmatprep.subr.mxu1 %v3727_v14  ;;  %v4562_v13 = vld [vmem:[#allocation47_spill] sm:$0xff]  ;;  %v4563_v14 = vld [vmem:[#allocation25_spill] sm:$0xff] }
 0x64e   : > { %2282 = vmatpush1.msra.mxu0 %v3731_v15  ;;  %2353 = vmatpush1.msra.mxu1 %v3733_v16  ;;  %v4564_v15 = vld [vmem:[#allocation26_spill] sm:$0xff]  ;;  %v4565_v16 = vld [vmem:[#allocation27_spill] sm:$0xff] }
 0x64f   : > { %2283 = vmatprep.subr.mxu0 %v3737_v17  ;;  %2354 = vmatprep.subr.mxu1 %v3739_v18  ;;  %v4566_v17 = vld [vmem:[#allocation28_spill] sm:$0xff]  ;;  %v4567_v18 = vld [vmem:[#allocation29_spill] sm:$0xff] }
 0x650   : > { %2284 = vmatpush1.msra.mxu0 %v3743_v19  ;;  %2355 = vmatpush1.msra.mxu1 %v3745_v20  ;;  %v4568_v19 = vld [vmem:[#allocation30_spill] sm:$0xff]  ;;  %v4569_v20 = vld [vmem:[#allocation31_spill] sm:$0xff] }
 0x651   : > { %2285 = vmatprep.subr.mxu0 %v3749_v21  ;;  %2356 = vmatprep.subr.mxu1 %v3751_v22  ;;  %v4570_v21 = vld [vmem:[#allocation32_spill] sm:$0xff]  ;;  %v4571_v22 = vld [vmem:[#allocation33_spill] sm:$0xff] }
 0x652   : > { %2286 = vmatpush1.msra.mxu0 %v3755_v23  ;;  %2357 = vmatpush1.msra.mxu1 %v3757_v24  ;;  %v4572_v23 = vmov 0.0   ;;  %v4573_v24 = vld [vmem:[#allocation34_spill] sm:$0xff] }
 0x653   : > { %2287 = vmatprep.subr.mxu0 %v3761_v25  ;;  %2358 = vmatprep.subr.mxu1 %v3763_v26  ;;  %v4574_v25 = vld [vmem:[#allocation41_spill] sm:$0xff]  ;;  %v4575_v26 = vld [vmem:[#allocation38_spill] sm:$0xff] }
 0x654   : > { %2288 = vmatpush1.msra.mxu0 %v3767_v27  ;;  %2359 = vmatpush1.msra.mxu1 %v3769_v28  ;;  %v1630_v27 = vadd.f32 %v4575_v26, %v4574_v25  ;;  %v1636_v58 = vadd.f32 %v4579_v45, %v4574_v25 }
 0x655   : > { %2289 = vmatprep.subr.mxu0 %v3771_v29  ;;  %2360 = vmatprep.subr.mxu1 %v3775_v31  ;;  %v4576_v29 = vld [vmem:[#allocation40_spill] sm:$0xff] }
 0x656   : > { %2290 = vmatpush1.msra.mxu0 %v3777_v32  ;;  %2361 = vmatpush1.msra.mxu1 %v3779_v33  ;;  %v1632_v31 = vadd.f32 %v4576_v29, %v4547_v12 }
 0x657   : > { %2291 = vmatprep.subr.mxu0 %v3783_v34  ;;  %2362 = vmatprep.subr.mxu1 %v3785_v35 }
 0x658   : > { %2292 = vmatpush1.msra.mxu0 %v3787_v36  ;;  %2363 = vmatpush1.msra.mxu1 %v3791_v37 }
 0x659   : > { %2293 = vmatprep.subr.mxu0 %v3793_v38  ;;  %2364 = vmatprep.subr.mxu1 %v3795_v39  ;;  %v4577_v38 = vld [vmem:[#allocation46_spill] sm:$0xff] }
 0x65a   : > { %2294 = vmatpush1.msra.mxu0 %v3799_v40  ;;  %2365 = vmatpush1.msra.mxu1 %v3801_v41  ;;  %v1719_v39 = vadd.f32 %v4577_v38, %v4549_v48 }
 0x65b   : > { %2295 = vmatprep.subr.mxu0 %v3805_v42  ;;  %2366 = vmatprep.subr.mxu1 %v3807_v43  ;;  %v4578_v42 = vld [vmem:[#allocation55_spill] sm:$0xff] }
 0x65c   : > { %2296 = vmatpush1.msra.mxu0 %v3811_v44  ;;  %2367 = vmatpush1.msra.mxu1 %v4552_v62  ;;  %v1721_v43 = vadd.f32 %v4578_v42, %v4000_v3  ;;  %v4580_v62 = vld [vmem:[#allocation51_spill] sm:$0xff] }
 0x65d   : > { %2297 = vmatprep.subr.mxu0 %v4553_v11  ;;  %2368 = vmatprep.subr.mxu1 %v4554_v47  ;;  %v1638_v11 = vadd.f32 %v4580_v62, %v4547_v12 }
 0x65e   : > { %2298 = vmatpush1.msra.mxu0 %v4555_v59  ;;  %2369 = vmatpush1.msra.mxu1 %v4556_v9 }
 0x65f   : > { %2299 = vmatprep.subr.mxu0 %v4557_v0  ;;  %2370 = vmatprep.subr.mxu1 %v4558_v1 }
 0x660   : > { %2300 = vmatpush1.msra.mxu0 %v4559_v63  ;;  %2371 = vmatpush1.msra.mxu1 %v4560_v6  ;;  %v4581_v63 = vld [vmem:[#allocation50_spill] sm:$0xff] }
 0x661   : > { %2301 = vmatprep.subr.mxu0 %v4561_v10  ;;  %2372 = vmatprep.subr.mxu1 %v4562_v13  ;;  %v1725_v6 = vadd.f32 %v4581_v63, %v4549_v48 }
 0x662   : > { %2302 = vmatpush1.msra.mxu0 %v4563_v14  ;;  %2373 = vmatpush1.msra.mxu1 %v4564_v15  ;;  %v4582_v14 = vld [vmem:[#allocation52_spill] sm:$0xff] }
 0x663   : > { %2303 = vmatprep.subr.mxu0 %v4565_v16  ;;  %2374 = vmatprep.subr.mxu1 %v4566_v17  ;;  %v1727_v15 = vadd.f32 %v4582_v14, %v4000_v3 }
 0x664   : > { %2304 = vmatpush1.msra.mxu0 %v4567_v18  ;;  %2375 = vmatpush1.msra.mxu1 %v4568_v19 }
 0x665   : > { %2305 = vmatprep.subr.mxu0 %v4569_v20  ;;  %2376 = vmatprep.subr.mxu1 %v4570_v21 }
 0x666   : > { %2306 = vmatpush1.msra.mxu0 %v4571_v22  ;;  %2339 = vmatprep.mubr.f32.mxu0 %v4572_v23 }
 0x667   : > { %2377 = vmatpush1.msra.mxu1 %v4573_v24  ;;  %2410 = vmatprep.mubr.f32.mxu1 %v4572_v23 }
 0x707   : > { %v2167_v28 = vpop.f32.mrf.mxu0  ;;  %v2238_v37 = vpop.f32.mrf.mxu1 }
 0x708   : > { %v2243_v32 = vadd.f32 %v2167_v28, %v1630_v27  ;;  %v2245_v40 = vadd.f32 %v2238_v37, %v1719_v39 }
 0x709   : > { %v2169_v33 = vpop.f32.mrf.mxu0  ;;  %v2240_v41 = vpop.f32.mrf.mxu1 }
 0x70a   : > { %v2666_v34 = vmul.f32 -1.442695, %v2243_v32  ;;  %v2244_v35 = vadd.f32 %v2169_v33, %v1632_v31  ;;  %v2668_v44 = vmul.f32 -1.442695, %v2245_v40  ;;  %v2246_v4 = vadd.f32 %v2240_v41, %v1721_v43 }
 0x70c   : > { %2878 = vpow2.f32 %v2666_v34  ;;  %v2667_v36 = vmul.f32 -1.442695, %v2244_v35 }
 0x70e   : > { %2880 = vpow2.f32 %v2667_v36 }
 0x70f   : > { %2882 = vpow2.f32 %v2668_v44 }
 0x719   : > { %v2879_v46 = vpop.eup %2878 }
 0x71a   : > { %v2256_v53 = vadd.f32 1.0, %v2879_v46 }
 0x71b   : > { %v2881_v52 = vpop.eup %2880 }
 0x71c   : > { %2884 = vrcp.f32 %v2256_v53  ;;  %v2257_v5 = vadd.f32 1.0, %v2881_v52  ;;  %v2883_v7 = vpop.eup %2882 }
 0x71d   : > { %2886 = vtanh.f32 %v2246_v4  ;;  %v2258_v51 = vadd.f32 1.0, %v2883_v7 }
 0x71e   : > { %2888 = vrcp.f32 %v2257_v5 }
 0x71f   : > { %2890 = vrcp.f32 %v2258_v51 }
 0x729   : > { %v2885_v61 = vpop.eup %2884 }
 0x72a   : > { %v2887_v8 = vpop.eup %2886 }
 0x72b   : > { %v2889_v54 = vpop.eup %2888  ;;  %v2267_v55 = vmul.f32 %v2887_v8, %v2885_v61 }
 0x72c   : > { %v2266_v30 = vmul.f32 %v2889_v54, %v4081_v60  ;;  %v2891_v49 = vpop.eup %2890 }
 0x72e   : > { %v2268_v2 = vadd.f32 %v2267_v55, %v2266_v30 }
 0x730   : > { %2892 = vtanh.f32 %v2268_v2 }
 0x73d   : > { %v2893_v56 = vpop.eup %2892 }
 0x73e   : > { %v2270_v57 = vmul.f32 %v2893_v56, %v2891_v49 }
 0x740   : > { %2340 = vmatmul.mubr.f32.vlgmr.msra.gmra.mxu0 %v2270_v57  ;;  %2411 = vmatmul.mubr.f32.vlgmr.msra.gmra.mxu1 %v2270_v57 }
 0x800   : > { %v2341_v50 = vpop.f32.mrf.mxu0  ;;  %v2412_v1 = vpop.f32.mrf.mxu1 }
 0x801   : > { %v2417_v47 = vadd.f32 %v2341_v50, %v1636_v58  ;;  %v2419_v10 = vadd.f32 %v2412_v1, %v1725_v6 }
 0x802   : > { %v2343_v59 = vpop.f32.mrf.mxu0  ;;  %v2414_v13 = vpop.f32.mrf.mxu1 }
 0x803   : > { %v2669_v9 = vmul.f32 -1.442695, %v2417_v47  ;;  %v2418_v60 = vadd.f32 %v2343_v59, %v1638_v11  ;;  %v2671_v16 = vmul.f32 -1.442695, %v2419_v10  ;;  %v2420_v17 = vadd.f32 %v2414_v13, %v1727_v15 }
 0x805   : > { %2894 = vpow2.f32 %v2669_v9  ;;  %v2670_v0 = vmul.f32 -1.442695, %v2418_v60 }
 0x807   : > { %2896 = vpow2.f32 %v2670_v0 }
 0x808   : > { %2898 = vpow2.f32 %v2671_v16 }
 0x809   : > { %2900 = vtanh.f32 %v2420_v17 }
 0x812   : > { %v2895_v18 = vpop.eup %2894 }
 0x813   : > { %v2430_v12 = vadd.f32 1.0, %v2895_v18 }
 0x814   : > { %v2897_v19 = vpop.eup %2896 }
 0x815   : > { %2902 = vrcp.f32 %v2430_v12  ;;  %v2431_v20 = vadd.f32 1.0, %v2897_v19  ;;  %v2899_v21 = vpop.eup %2898 }
 0x816   : > { %v2901_v22 = vpop.eup %2900  ;;  %v2432_v25 = vadd.f32 1.0, %v2899_v21 }
 0x817   : > { %2904 = vrcp.f32 %v2431_v20 }
 0x818   : > { %2906 = vrcp.f32 %v2432_v25 }
 0x822   : > { %v2903_v23 = vpop.eup %2902 }
 0x823   : > { %v2441_v24 = vmul.f32 %v2903_v23, %v2901_v22 }
 0x824   : > { %v2905_v48 = vpop.eup %2904 }
 0x825   : > { %v2440_v26 = vmul.f32 %v2905_v48, %v2268_v2  ;;  %v2907_v3 = vpop.eup %2906 }
 0x827   : > { %v2442_v27 = vadd.f32 %v2441_v24, %v2440_v26 }
 0x829   : > { %2908 = vtanh.f32 %v2442_v27  ;;  %2446 = vst [vmem:[#allocation3] sm:$0xff] %v2442_v27 }
 0x835   : > { %2450 = sbr.rel (%p2672_p3) target bundleno = 2335 (0x91f), region = 76 }
 0x836   : > { %v2909_v28 = vpop.eup %2908 }
 0x837   : > { %v2444_v29 = vmul.f32 %v2909_v28, %v2907_v3 }
 0x839   : > { %2445 = vst [vmem:[#allocation2 + $0x8] sm:$0xff] %v2444_v29 }
 0x83a   : > { %v2467_v31 = vld [vmem:[%s4239_s7 + $0x78] sm:$0xff]  ;;  %v3039_v32 = vmov 0.0   ;;  %v2466_v33 = vld [vmem:[%s4239_s7 + $0x70] sm:$0xff]  ;;  %vm3040_vm1 = vmmov 0   ;;  %v2465_v34 = vld [vmem:[%s4239_s7 + $0x68] sm:$0xff]  ;;  %vm2545_vm2 = vcmask 64512  }
 0x83b   : > { %2695 = vmatprep.subr.mxu0 %v3039_v32  ;;  %2727 = vmatprep.mubr.msk.f32.mxu0 %vm3040_vm1, %v3039_v32  ;;  %v2464_v35 = vld [vmem:[%s4239_s7 + $0x60] sm:$0xff]  ;;  %v2463_v36 = vld [vmem:[%s4239_s7 + $0x58] sm:$0xff]  ;;  %v2462_v37 = vld [vmem:[%s4239_s7 + $0x50] sm:$0xff] }
 0x83c   : > { %2696 = vmatpush3.msra.mxu0 %v2467_v31  ;;  %v2461_v38 = vld [vmem:[%s4239_s7 + $0x48] sm:$0xff]  ;;  %v2460_v39 = vld [vmem:[%s4239_s7 + $0x40] sm:$0xff]  ;;  %v2459_v40 = vld [vmem:[%s4239_s7 + $0x38] sm:$0xff] }
 0x83d   : > { %2697 = vmatprep.subr.mxu0 %v3039_v32  ;;  %v2458_v41 = vld [vmem:[%s4239_s7 + $0x30] sm:$0xff]  ;;  %v2457_v42 = vld [vmem:[%s4239_s7 + $0x28] sm:$0xff]  ;;  %v2456_v43 = vld [vmem:[%s4239_s7 + $0x20] sm:$0xff] }
 0x83e   : > { %2698 = vmatpush3.msra.mxu0 %v2466_v33  ;;  %v2455_v44 = vld [vmem:[%s4239_s7 + $0x18] sm:$0xff]  ;;  %v2454_v46 = vld [vmem:[%s4239_s7 + $0x10] sm:$0xff]  ;;  %v2453_v4 = vld [vmem:[%s4239_s7 + $0x8] sm:$0xff] }
 0x83f   : > { %2699 = vmatprep.subr.mxu0 %v3039_v32  ;;  %v2452_v53 = vld [vmem:[%s4239_s7] sm:$0xff] }
 0x840   : > { %2700 = vmatpush3.msra.mxu0 %v2465_v34  ;;  %v2451_v52 = vld [vmem:[#allocation2 + $0x8] sm:$0xff]  ;;  %v2673_v5 = vld [vmem:[%s4240_s8] ss:$0 sm:$0xff] }
 0x841   : > { %2701 = vmatprep.subr.mxu0 %v3039_v32 }
 0x842   : > { %2702 = vmatpush3.msra.mxu0 %v2464_v35 }
 0x843   : > { %2703 = vmatprep.subr.mxu0 %v3039_v32 }
 0x844   : > { %2704 = vmatpush3.msra.mxu0 %v2463_v36 }
 0x845   : > { %2705 = vmatprep.subr.mxu0 %v3039_v32 }
 0x846   : > { %2706 = vmatpush3.msra.mxu0 %v2462_v37 }
 0x847   : > { %2707 = vmatprep.subr.mxu0 %v3039_v32 }
 0x848   : > { %2708 = vmatpush3.msra.mxu0 %v2461_v38 }
 0x849   : > { %2709 = vmatprep.subr.mxu0 %v3039_v32 }
 0x84a   : > { %2710 = vmatpush3.msra.mxu0 %v2460_v39 }
 0x84b   : > { %2711 = vmatprep.subr.mxu0 %v3039_v32 }
 0x84c   : > { %2712 = vmatpush3.msra.mxu0 %v2459_v40 }
 0x84d   : > { %2713 = vmatprep.subr.mxu0 %v3039_v32 }
 0x84e   : > { %2714 = vmatpush3.msra.mxu0 %v2458_v41 }
 0x84f   : > { %2715 = vmatprep.subr.mxu0 %v3039_v32 }
 0x850   : > { %2716 = vmatpush3.msra.mxu0 %v2457_v42 }
 0x851   : > { %2717 = vmatprep.subr.mxu0 %v3039_v32 }
 0x852   : > { %2718 = vmatpush3.msra.mxu0 %v2456_v43 }
 0x853   : > { %2719 = vmatprep.subr.mxu0 %v3039_v32 }
 0x854   : > { %2720 = vmatpush3.msra.mxu0 %v2455_v44 }
 0x855   : > { %2721 = vmatprep.subr.mxu0 %v3039_v32 }
 0x856   : > { %2722 = vmatpush3.msra.mxu0 %v2454_v46 }
 0x857   : > { %2723 = vmatprep.subr.mxu0 %v3039_v32 }
 0x858   : > { %2724 = vmatpush3.msra.mxu0 %v2453_v4 }
 0x859   : > { %2725 = vmatprep.subr.mxu0 %v3039_v32 }
 0x85a   : > { %2726 = vmatpush3.msra.mxu0 %v2452_v53 }
 0x85b   : > { %2728 = vmatmul.mubr.f32.vlgmr.msra.gmra.mxu0 %v2451_v52 }
 0x91b   : > { %v2541_v7 = vpop.f32.mrf.mxu0 }
 0x91c   : > { %v2542_v61 = vadd.f32 %v2673_v5, %v2541_v7 }
 0x91d   : > { %v2729_v8 = vpop.f32.mrf.mxu0 }
 0x91e   : > { %2546 = vst.msk [vmem:[#allocation12] sm:$0xff] %vm2545_vm2, %v2542_v61 }
 0x91f PF: > { %p2762_p6 = scmp.eq.s32.totalorder %s3098_s10, 1  ;;  %s3041_s14 = smov [#allocation12]  }
 0x920   : > { %s2554_s11 = sshll.u32 %s3041_s14, 4  ;;  %s2555_s11 = int_to_ptr.vmem [resolvable:$true] %s2554_s11 }
 0x921   : > { %s2988_s15 = scalar_lea.vmem %s2555_s11, 128  ;;  %p2995_p12 = scmp.lt.s32.totalorder %s2555_s11, %s2555_s11 }
 0x922   : > { %p2989_p9 = scmp.ne.s32.totalorder %s2555_s11, %s2988_s15  ;;  %p2996_p13 = scmp.lt.s32.totalorder %s2988_s15, %s2988_s15 }
 0x924   : > { %p2990_p11 = pnand %p2989_p9, %p2762_p6  ;;  %p2997_p0 = por %p2996_p13, %p2995_p12 }
 0x926   : > { %p2991_p10 = pneg %p2990_p11 }
 0x928   : > { %p2998_p2 = pnand %p2997_p0, %p2991_p10 }
 0x92a   : > { %3001 = shalt.err (!%p2998_p2)
}
 0x92b   : > { %2743 = dma.vmem_to_hbm [thread:$0]  (%p2762_p6), %s2555_s11, 128, %s4241_s9, [#allocation8]  }
 0x92c   : > { %3025 = dma.done.wait (%p2762_p6), [#allocation8], 128  }
 0x92d   : > { %3027 = vsyncadd (%p2762_p6), [#allocation8], 4294967168 }
 0x92e PF: > { %s22_s30 = sadd.s32 1, %s3030_s30  }
 0x92f   : > { %p19_p1 = scmp.ge.s32.totalorder %s22_s30, 4  }
 0x931   :  { %21 = sbr.rel (!%p19_p1) target bundleno = 3 (0x3), region = 113 }
 0x936   :  { %2567 = vsyncpa [#allocation7], 1 }
 0x937   :  { %2569 = vsyncpa [#allocation7 + $0x1], 1 }
 0x938   :  { %2570 = vsyncpa [#allocation10], 1 }
 0x939   :  { %2571 = vsyncpa [#allocation8], 1 }
 0x93a   :  { %2573 = vsyncpa [#allocation8 + $0x1], 1 }

</bundles_post_ra>
